<compile_context>
chip_gen: v7x
topology: tpu7x:2x2x1
jax: 0.10.0
libtpu: 0.0.40
codegen_flags: <defaults>
</compile_context>

<pallas_src>
from functools import partial

import jax
import jax.numpy as jnp
from jax.experimental import pallas as pl
from jax.experimental.pallas import tpu as pltpu

EPS = 1e-5


def bn_relu_kernel(x_ref, gamma_ref, beta_ref, o_ref, *, inv_l):
    # x_ref: (Cb, L) f32 -- unpadded, block extent == true data extent.
    # gamma_ref / beta_ref: (Cb, 1) f32.   o_ref: (Cb, L).
    x = x_ref[...].astype(jnp.float32)

    # Single-pass moments via exact f32 lane reductions (XLU/VPU).  No MXU
    # bf16 rounding, no wasted result-FIFO pops, no tail-lane mask needed.
    s1 = jnp.sum(x, axis=-1, keepdims=True)             # (Cb, 1) sum(x)
    s2 = jnp.sum(x * x, axis=-1, keepdims=True)         # (Cb, 1) sum(x^2)

    mean = s1 * inv_l                                    # true L reciprocal (compile-time const)
    var = jnp.maximum(s2 * inv_l - mean * mean, 0.0)     # clamp tiny negative variance
    inv_std = jax.lax.rsqrt(var + EPS)                   # EUP

    # Fold affine into one per-channel scale/bias, computed once on (Cb, 1).
    scale = gamma_ref[...].astype(jnp.float32) * inv_std
    bias = beta_ref[...].astype(jnp.float32) - mean * scale

    # Re-read x from VMEM (3 vld slots/cycle) instead of keeping the whole
    # tile live across the reductions -> no spill/fill, store slot stays free
    # for the actual output writes.
    x2 = x_ref[...].astype(jnp.float32)
    o_ref[...] = jnp.maximum(x2 * scale + bias, 0.0).astype(o_ref.dtype)


def _default_channel_grid():
    """2-way channel split only on v7x (2 TensorCores/chip); 1 elsewhere."""
    try:
        kind = jax.devices()[0].device_kind.lower()
    except Exception:
        return 1
    return 2 if "v7" in kind else 1


def batchnorm_relu(x_nchw, gamma, beta):
    """x_nchw: (N, C, H, W) float32; gamma/beta: (C,) float32."""
    N, C, H, W = x_nchw.shape
    L = N * H * W

    if N == 1:
        # Pure reshape: guaranteed free layout change (no transpose, no pad).
        x_cl = x_nchw.reshape(C, L).astype(jnp.float32)
    else:
        x_cl = jnp.transpose(x_nchw, (1, 0, 2, 3)).reshape(C, L).astype(jnp.float32)

    g = gamma.reshape(C, 1).astype(jnp.float32)
    b = beta.reshape(C, 1).astype(jnp.float32)

    kern = partial(bn_relu_kernel, inv_l=1.0 / L)
    out_shape = jax.ShapeDtypeStruct((C, L), x_nchw.dtype)

    cg = _default_channel_grid()
    if cg > 1 and (C % cg != 0 or (C // cg) % 8 != 0):
        cg = 1

    if cg == 1:
        # Single resident block (~0.4 MiB << VMEM): no grid, no per-step overhead.
        out_cl = pl.pallas_call(
            kern,
            out_shape=out_shape,
            in_specs=[
                pl.BlockSpec(memory_space=pltpu.MemorySpace.VMEM),
                pl.BlockSpec(memory_space=pltpu.MemorySpace.VMEM),
                pl.BlockSpec(memory_space=pltpu.MemorySpace.VMEM),
            ],
            out_specs=pl.BlockSpec(memory_space=pltpu.MemorySpace.VMEM),
        )(x_cl, g, b)
    else:
        # v7x: split channels across both TensorCores (stats are per-channel,
        # so a channel split is exact).
        cb = C // cg
        out_cl = pl.pallas_call(
            kern,
            out_shape=out_shape,
            grid=(cg,),
            in_specs=[
                pl.BlockSpec((cb, L), lambda i: (i, 0)),
                pl.BlockSpec((cb, 1), lambda i: (i, 0)),
                pl.BlockSpec((cb, 1), lambda i: (i, 0)),
            ],
            out_specs=pl.BlockSpec((cb, L), lambda i: (i, 0)),
            compiler_params=pltpu.CompilerParams(
                dimension_semantics=("parallel",)),
        )(x_cl, g, b)

    if N == 1:
        return out_cl.reshape(N, C, H, W)
    return jnp.transpose(out_cl.reshape(C, N, H, W), (1, 0, 2, 3))


def reference(x_nchw, gamma, beta):
    mean = jnp.mean(x_nchw, axis=(0, 2, 3), keepdims=True)
    var = jnp.mean((x_nchw - mean) ** 2, axis=(0, 2, 3), keepdims=True)
    y = (x_nchw - mean) * jax.lax.rsqrt(var + EPS)
    y = y * gamma.reshape(1, -1, 1, 1) + beta.reshape(1, -1, 1, 1)
    return jnp.maximum(y, 0.0)


if __name__ == "__main__":
    key = jax.random.PRNGKey(0)
    kx, kg, kb = jax.random.split(key, 3)

    N, C, H, W = 1, 256, 14, 14  # shape implied by BatchNorm2d(256) and x421
    x = jax.random.normal(kx, (N, C, H, W), dtype=jnp.float32)
    # Deterministic affine parameters (PyTorch default would be ones/zeros;
    # random-but-seeded values also exercise the affine path).
    gamma = 1.0 + 0.1 * jax.random.normal(kg, (C,), dtype=jnp.float32)
    beta = 0.1 * jax.random.normal(kb, (C,), dtype=jnp.float32)

    out = batchnorm_relu(x, gamma, beta)
    out = jax.block_until_ready(out)

    ref = reference(x, gamma, beta)
    assert out.shape == (N, C, H, W)
    assert jnp.allclose(out, ref, atol=1e-4, rtol=1e-4), "mismatch vs reference"

    print("KERNEL_OK")
</pallas_src>

<mosaic_0001>
module attributes {stable_mosaic.version = 11 : i64} {
  func.func @bn_relu_kernel(%arg0: memref<256x196xf32, #tpu.memory_space<vmem>>, %arg1: memref<256x1xf32, #tpu.memory_space<vmem>>, %arg2: memref<256x1xf32, #tpu.memory_space<vmem>>, %arg3: memref<256x196xf32, #tpu.memory_space<vmem>>) attributes {dimension_semantics = [], scalar_prefetch = 0 : i64, scratch_operands = 0 : i64, tpu.core_type = #tpu.core_type<tc>} {
    %c0 = arith.constant 0 : index
    %c0_0 = arith.constant 0 : index
    %0 = vector.load %arg0[%c0, %c0_0] : memref<256x196xf32, #tpu.memory_space<vmem>>, vector<256x196xf32>
    %cst = arith.constant dense<0.000000e+00> : vector<256xf32>
    %1 = vector.multi_reduction <add>, %0, %cst [1] : vector<256x196xf32> to vector<256xf32>
    %2 = vector.shape_cast %1 : vector<256xf32> to vector<256x1xf32>
    %3 = arith.mulf %0, %0 : vector<256x196xf32>
    %cst_1 = arith.constant dense<0.000000e+00> : vector<256xf32>
    %4 = vector.multi_reduction <add>, %3, %cst_1 [1] : vector<256x196xf32> to vector<256xf32>
    %5 = vector.shape_cast %4 : vector<256xf32> to vector<256x1xf32>
    %cst_2 = arith.constant 0.00510204071 : f32
    %6 = vector.broadcast %cst_2 : f32 to vector<256x1xf32>
    %7 = arith.mulf %2, %6 : vector<256x1xf32>
    %cst_3 = arith.constant 0.00510204071 : f32
    %8 = vector.broadcast %cst_3 : f32 to vector<256x1xf32>
    %9 = arith.mulf %5, %8 : vector<256x1xf32>
    %10 = arith.mulf %7, %7 : vector<256x1xf32>
    %11 = arith.subf %9, %10 : vector<256x1xf32>
    %cst_4 = arith.constant 0.000000e+00 : f32
    %12 = vector.broadcast %cst_4 : f32 to vector<256x1xf32>
    %13 = arith.maximumf %11, %12 : vector<256x1xf32>
    %cst_5 = arith.constant 9.99999974E-6 : f32
    %14 = vector.broadcast %cst_5 : f32 to vector<256x1xf32>
    %15 = arith.addf %13, %14 : vector<256x1xf32>
    %16 = math.rsqrt %15 : vector<256x1xf32>
    %c0_6 = arith.constant 0 : index
    %c0_7 = arith.constant 0 : index
    %17 = vector.load %arg1[%c0_6, %c0_7] : memref<256x1xf32, #tpu.memory_space<vmem>>, vector<256x1xf32>
    %18 = arith.mulf %17, %16 : vector<256x1xf32>
    %c0_8 = arith.constant 0 : index
    %c0_9 = arith.constant 0 : index
    %19 = vector.load %arg2[%c0_8, %c0_9] : memref<256x1xf32, #tpu.memory_space<vmem>>, vector<256x1xf32>
    %20 = arith.mulf %7, %18 : vector<256x1xf32>
    %21 = arith.subf %19, %20 : vector<256x1xf32>
    %c0_10 = arith.constant 0 : index
    %c0_11 = arith.constant 0 : index
    %22 = vector.load %arg0[%c0_10, %c0_11] : memref<256x196xf32, #tpu.memory_space<vmem>>, vector<256x196xf32>
    %23 = vector.broadcast %18 : vector<256x1xf32> to vector<256x196xf32>
    %24 = arith.mulf %22, %23 : vector<256x196xf32>
    %25 = vector.broadcast %21 : vector<256x1xf32> to vector<256x196xf32>
    %26 = arith.addf %24, %25 : vector<256x196xf32>
    %cst_12 = arith.constant 0.000000e+00 : f32
    %27 = vector.broadcast %cst_12 : f32 to vector<256x196xf32>
    %28 = arith.maximumf %26, %27 : vector<256x196xf32>
    %c0_13 = arith.constant 0 : index
    %c0_14 = arith.constant 0 : index
    %29 = vector.load %arg3[%c0_13, %c0_14] : memref<256x196xf32, #tpu.memory_space<vmem>>, vector<256x196xf32>
    tpu.vector_store %arg3[%c0_13, %c0_14], %28 {strides = array<i32>} : memref<256x196xf32, #tpu.memory_space<vmem>>, vector<256x196xf32>,
    return
  }
}

</mosaic_0001>

<bundles_post_ra>
// kernel: tpu_custom_call.1
= control target key start
LH: loop header
LB: loop body
LE: loop exit
PB: predicated region body
PF: predicated region fallthrough
CT: control target
= control target key end

     0   :  { %vm78_vm0 = vcmask 556032   ;;  %s3204_s0 = inlined_call_operand.vmem [shape: f32[256,196], index: 0, kind: input, shape index: {}]   ;;  %s3205_s1 = inlined_call_operand.vmem [shape: f32[256,1], index: 1, kind: input, shape index: {}]   ;;  %s3206_s2 = inlined_call_operand.vmem [shape: f32[256,1], index: 2, kind: input, shape index: {}]   ;;  %s3207_s3 = inlined_call_operand.vmem [shape: f32[256,196], index: 3, kind: output, shape index: {}]  }
   0x1   :  { %v1518_v0 = vld [vmem:[%s3204_s0 + $0x20] sm:$0xff]  ;;  %v1523_v1 = vld [vmem:[%s3204_s0 + $0x28] sm:$0xff]  ;;  %v1540_v5 = vld [vmem:[%s3204_s0 + $0x30] sm:$0xff] }
   0x2   :  { %v1528_v2 = vld [vmem:[%s3204_s0] sm:$0xff]  ;;  %v87_v3 = vsel %vm78_vm0, %v1523_v1, 0.0  ;;  %v1535_v4 = vld [vmem:[%s3204_s0 + $0x8] sm:$0xff]  ;;  %v1545_v6 = vld [vmem:[%s3204_s0 + $0x38] sm:$0xff] }
   0x3   :  { %v88_v7 = vadd.f32 %v87_v3, %v1518_v0  ;;  %v79_v8 = vsel %vm78_vm0, %v1535_v4, 0.0  ;;  %v91_v9 = vsel %vm78_vm0, %v1545_v6, 0.0  ;;  %v1555_v10 = vld [vmem:[%s3204_s0 + $0x10] sm:$0xff]  ;;  %v1560_v11 = vld [vmem:[%s3204_s0 + $0x18] sm:$0xff]  ;;  %v1573_v15 = vld [vmem:[%s3204_s0 + $0x48] sm:$0xff] }
   0x4   :  { %v80_v12 = vadd.f32 %v79_v8, %v1528_v2  ;;  %v83_v13 = vsel %vm78_vm0, %v1560_v11, 0.0  ;;  %v1568_v14 = vld [vmem:[%s3204_s0 + $0x58] sm:$0xff]  ;;  %v92_v16 = vadd.f32 %v91_v9, %v1540_v5  ;;  %v1580_v18 = vld [vmem:[%s3204_s0 + $0x50] sm:$0xff]  ;;  %v1587_v20 = vld [vmem:[%s3204_s0 + $0x40] sm:$0xff]  ;;  %v95_v21 = vsel %vm78_vm0, %v1573_v15, 0.0 }
   0x5   :  { %89 = vadd.xlane.f32.xlu1 %v88_v7  ;;  %v84_v17 = vadd.f32 %v83_v13, %v1555_v10  ;;  %v99_v19 = vsel %vm78_vm0, %v1568_v14, 0.0  ;;  %v1594_v22 = vld [vmem:[%s3204_s0 + $0x78] sm:$0xff]  ;;  %v1599_v23 = vld [vmem:[%s3204_s0 + $0x68] sm:$0xff]  ;;  %v96_v25 = vadd.f32 %v95_v21, %v1587_v20  ;;  %v1606_v26 = vld [vmem:[%s3204_s0 + $0x70] sm:$0xff] }
   0x6   :  { %81 = vadd.xlane.f32.xlu0 %v80_v12  ;;  %v100_v24 = vadd.f32 %v99_v19, %v1580_v18  ;;  %v107_v27 = vsel %vm78_vm0, %v1594_v22, 0.0  ;;  %v1613_v28 = vld [vmem:[%s3204_s0 + $0x60] sm:$0xff]  ;;  %v103_v29 = vsel %vm78_vm0, %v1599_v23, 0.0  ;;  %v1620_v30 = vld [vmem:[%s3204_s0 + $0x98] sm:$0xff]  ;;  %v1625_v31 = vld [vmem:[%s3204_s0 + $0x88] sm:$0xff] }
   0x7   :  { %v108_v32 = vadd.f32 %v107_v27, %v1606_v26  ;;  %v104_v33 = vadd.f32 %v103_v29, %v1613_v28  ;;  %v1632_v34 = vld [vmem:[%s3204_s0 + $0x90] sm:$0xff]  ;;  %v115_v35 = vsel %vm78_vm0, %v1620_v30, 0.0  ;;  %v1639_v36 = vld [vmem:[%s3204_s0 + $0x80] sm:$0xff]  ;;  %v111_v37 = vsel %vm78_vm0, %v1625_v31, 0.0  ;;  %v1646_v38 = vld [vmem:[%s3204_s0 + $0xb8] sm:$0xff] }
   0x8   :  { %v1651_v39 = vld [vmem:[%s3204_s0 + $0xa8] sm:$0xff]  ;;  %v116_v40 = vadd.f32 %v115_v35, %v1632_v34  ;;  %v112_v41 = vadd.f32 %v111_v37, %v1639_v36  ;;  %v1658_v42 = vld [vmem:[%s3204_s0 + $0xb0] sm:$0xff]  ;;  %v123_v43 = vsel %vm78_vm0, %v1646_v38, 0.0  ;;  %v1665_v44 = vld [vmem:[%s3204_s0 + $0xa0] sm:$0xff] }
   0x9   :  { %93 = vadd.xlane.f32.xlu1 %v92_v16  ;;  %v119_v45 = vsel %vm78_vm0, %v1651_v39, 0.0  ;;  %v1672_v46 = vld [vmem:[%s3204_s0 + $0xd8] sm:$0xff]  ;;  %v1677_v47 = vld [vmem:[%s3204_s0 + $0xc8] sm:$0xff]  ;;  %v124_v48 = vadd.f32 %v123_v43, %v1658_v42  ;;  %v1684_v50 = vld [vmem:[%s3204_s0 + $0xd0] sm:$0xff] }
   0xa   :  { %85 = vadd.xlane.f32.xlu0 %v84_v17  ;;  %v120_v49 = vadd.f32 %v119_v45, %v1665_v44  ;;  %v131_v51 = vsel %vm78_vm0, %v1672_v46, 0.0  ;;  %v1691_v52 = vld [vmem:[%s3204_s0 + $0xc0] sm:$0xff]  ;;  %v127_v53 = vsel %vm78_vm0, %v1677_v47, 0.0  ;;  %v1698_v54 = vld [vmem:[%s3204_s0 + $0xf8] sm:$0xff]  ;;  %v1703_v55 = vld [vmem:[%s3204_s0 + $0xe8] sm:$0xff] }
   0xb   :  { %v132_v56 = vadd.f32 %v131_v51, %v1684_v50  ;;  %v128_v57 = vadd.f32 %v127_v53, %v1691_v52  ;;  %v1710_v58 = vld [vmem:[%s3204_s0 + $0xf0] sm:$0xff]  ;;  %v139_v59 = vsel %vm78_vm0, %v1698_v54, 0.0  ;;  %v1717_v60 = vld [vmem:[%s3204_s0 + $0xe0] sm:$0xff]  ;;  %v135_v61 = vsel %vm78_vm0, %v1703_v55, 0.0  ;;  %v1724_v62 = vld [vmem:[%s3204_s0 + $0x118] sm:$0xff] }
   0xc   :  { %v1729_v63 = vld [vmem:[%s3204_s0 + $0x108] sm:$0xff]  ;;  %v140_v3 = vadd.f32 %v139_v59, %v1710_v58  ;;  %v136_v7 = vadd.f32 %v135_v61, %v1717_v60  ;;  %v1736_v8 = vld [vmem:[%s3204_s0 + $0x110] sm:$0xff]  ;;  %v147_v9 = vsel %vm78_vm0, %v1724_v62, 0.0  ;;  %v1743_v12 = vld [vmem:[%s3204_s0 + $0x100] sm:$0xff] }
   0xd   :  { %101 = vadd.xlane.f32.xlu1 %v100_v24  ;;  %v143_v13 = vsel %vm78_vm0, %v1729_v63, 0.0  ;;  %v1750_v16 = vld [vmem:[%s3204_s0 + $0x138] sm:$0xff]  ;;  %v1755_v17 = vld [vmem:[%s3204_s0 + $0x128] sm:$0xff]  ;;  %v148_v19 = vadd.f32 %v147_v9, %v1736_v8  ;;  %v1762_v24 = vld [vmem:[%s3204_s0 + $0x130] sm:$0xff] }
   0xe   :  { %97 = vadd.xlane.f32.xlu0 %v96_v25  ;;  %v144_v21 = vadd.f32 %v143_v13, %v1743_v12  ;;  %v155_v25 = vsel %vm78_vm0, %v1750_v16, 0.0  ;;  %v1769_v27 = vld [vmem:[%s3204_s0 + $0x120] sm:$0xff]  ;;  %v151_v29 = vsel %vm78_vm0, %v1755_v17, 0.0 }
   0xf   :  { %v156_v35 = vadd.f32 %v155_v25, %v1762_v24  ;;  %v152_v37 = vadd.f32 %v151_v29, %v1769_v27  ;;  %v1795_v43 = vld [vmem:[%s3204_s0 + $0x140] sm:$0xff] }
  0x10   :  { %v1821_v59 = vld [vmem:[%s3204_s0 + $0x160] sm:$0xff] }
  0x11   :  { %109 = vadd.xlane.f32.xlu1 %v108_v32  ;;  %v1776_v32 = vld [vmem:[%s3204_s0 + $0x158] sm:$0xff]  ;;  %v1847_v25 = vld [vmem:[%s3204_s0 + $0x180] sm:$0xff] }
  0x12   :  { %105 = vadd.xlane.f32.xlu0 %v104_v33  ;;  %v1781_v33 = vld [vmem:[%s3204_s0 + $0x148] sm:$0xff]  ;;  %3233 = vst [vmem:[#allocation3_spill] sm:$0xff] %v1847_v25 }
  0x13   :  { %v159_v45 = vsel %vm78_vm0, %v1781_v33, 0.0 }
  0x14   :  { %v160_v53 = vadd.f32 %v159_v45, %v1795_v43 }
  0x15   :  { %117 = vadd.xlane.f32.xlu1 %v116_v40  ;;  %v1788_v40 = vld [vmem:[%s3204_s0 + $0x150] sm:$0xff] }
  0x16   :  { %113 = vadd.xlane.f32.xlu0 %v112_v41  ;;  %v163_v41 = vsel %vm78_vm0, %v1776_v32, 0.0 }
  0x17   :  { %v164_v51 = vadd.f32 %v163_v41, %v1788_v40 }
  0x19   :  { %125 = vadd.xlane.f32.xlu1 %v124_v48  ;;  %v1802_v48 = vld [vmem:[%s3204_s0 + $0x178] sm:$0xff] }
  0x1a   :  { %121 = vadd.xlane.f32.xlu0 %v120_v49  ;;  %v1807_v49 = vld [vmem:[%s3204_s0 + $0x168] sm:$0xff] }
  0x1b   :  { %v167_v61 = vsel %vm78_vm0, %v1807_v49, 0.0 }
  0x1c   :  { %v168_v13 = vadd.f32 %v167_v61, %v1821_v59 }
  0x1d   :  { %133 = vadd.xlane.f32.xlu1 %v132_v56  ;;  %v1814_v56 = vld [vmem:[%s3204_s0 + $0x170] sm:$0xff] }
  0x1e   :  { %129 = vadd.xlane.f32.xlu0 %v128_v57  ;;  %v171_v57 = vsel %vm78_vm0, %v1802_v48, 0.0 }
  0x1f   :  { %v172_v9 = vadd.f32 %v171_v57, %v1814_v56  ;;  %v1873_v57 = vld [vmem:[%s3204_s0 + $0x1a0] sm:$0xff] }
  0x20   :  { %3237 = vst [vmem:[#allocation7_spill] sm:$0xff] %v1873_v57 }
  0x21   :  { %141 = vadd.xlane.f32.xlu1 %v140_v3  ;;  %v1828_v3 = vld [vmem:[%s3204_s0 + $0x198] sm:$0xff] }
  0x22   :  { %137 = vadd.xlane.f32.xlu0 %v136_v7  ;;  %v1833_v7 = vld [vmem:[%s3204_s0 + $0x188] sm:$0xff] }
  0x23   :  { %v175_v29 = vsel %vm78_vm0, %v1833_v7, 0.0 }
  0x24   :  { %v176_v45 = vadd.f32 %v175_v29, %v1847_v25  ;;  %v1899_v25 = vld [vmem:[%s3204_s0 + $0x1c0] sm:$0xff] }
  0x25   :  { %149 = vadd.xlane.f32.xlu1 %v148_v19  ;;  %v1840_v19 = vld [vmem:[%s3204_s0 + $0x190] sm:$0xff]  ;;  %3241 = vst [vmem:[#allocation11_spill] sm:$0xff] %v1899_v25 }
  0x26   :  { %145 = vadd.xlane.f32.xlu0 %v144_v21  ;;  %3232 = vst [vmem:[#allocation2_spill] sm:$0xff] %v1840_v19  ;;  %v179_v21 = vsel %vm78_vm0, %v1828_v3, 0.0 }
  0x27   :  { %v180_v41 = vadd.f32 %v179_v21, %v1840_v19 }
  0x29   :  { %157 = vadd.xlane.f32.xlu1 %v156_v35  ;;  %v1854_v35 = vld [vmem:[%s3204_s0 + $0x1b8] sm:$0xff] }
  0x2a   :  { %153 = vadd.xlane.f32.xlu0 %v152_v37  ;;  %3234 = vst [vmem:[#allocation4_spill] sm:$0xff] %v1854_v35  ;;  %v1859_v37 = vld [vmem:[%s3204_s0 + $0x1a8] sm:$0xff] }
  0x2b   :  { %3235 = vst [vmem:[#allocation5_spill] sm:$0xff] %v1859_v37  ;;  %v183_v61 = vsel %vm78_vm0, %v1859_v37, 0.0  ;;  %v1892_v37 = vld [vmem:[%s3204_s0 + $0x1d0] sm:$0xff] }
  0x2c   :  { %v184_v29 = vadd.f32 %v183_v61, %v1873_v57  ;;  %3240 = vst [vmem:[#allocation10_spill] sm:$0xff] %v1892_v37 }
  0x2d   :  { %165 = vadd.xlane.f32.xlu1 %v164_v51  ;;  %v1866_v51 = vld [vmem:[%s3204_s0 + $0x1b0] sm:$0xff] }
  0x2e   :  { %161 = vadd.xlane.f32.xlu0 %v160_v53  ;;  %3236 = vst [vmem:[#allocation6_spill] sm:$0xff] %v1866_v51  ;;  %v187_v53 = vsel %vm78_vm0, %v1854_v35, 0.0 }
  0x2f   :  { %v188_v21 = vadd.f32 %v187_v53, %v1866_v51  ;;  %v1911_v53 = vld [vmem:[%s3204_s0 + $0x1e8] sm:$0xff]  ;;  %v210_v51 = vmul.f32 %v1560_v11, %v1560_v11 }
  0x30   :  { %3243 = vst [vmem:[#allocation13_spill] sm:$0xff] %v1911_v53 }
  0x31   :  { %173 = vadd.xlane.f32.xlu1 %v172_v9  ;;  %v1880_v9 = vld [vmem:[%s3204_s0 + $0x1d8] sm:$0xff] }
  0x32   :  { %169 = vadd.xlane.f32.xlu0 %v168_v13  ;;  %3238 = vst [vmem:[#allocation8_spill] sm:$0xff] %v1880_v9  ;;  %v1885_v13 = vld [vmem:[%s3204_s0 + $0x1c8] sm:$0xff]  ;;  %v195_v35 = vsel %vm78_vm0, %v1880_v9, 0.0 }
  0x33   :  { %3239 = vst [vmem:[#allocation9_spill] sm:$0xff] %v1885_v13  ;;  %v196_v61 = vadd.f32 %v195_v35, %v1892_v37  ;;  %v199_v35 = vsel %vm78_vm0, %v1911_v53, 0.0  ;;  %v207_v37 = vmul.f32 %v1528_v2, %v1528_v2  ;;  %v214_v53 = vmul.f32 %v1545_v6, %v1545_v6 }
  0x34   :  { %v211_v2 = vmul.f32 %v1518_v0, %v1518_v0  ;;  %v218_v6 = vmul.f32 %v1568_v14, %v1568_v14  ;;  %v215_v0 = vmul.f32 %v1587_v20, %v1587_v20  ;;  %v222_v14 = vmul.f32 %v1594_v22, %v1594_v22 }
  0x35   :  { %181 = vadd.xlane.f32.xlu1 %v180_v41  ;;  %v191_v41 = vsel %vm78_vm0, %v1885_v13, 0.0  ;;  %v1918_v13 = vld [vmem:[%s3204_s0 + $0x1f0] sm:$0xff]  ;;  %v219_v20 = vmul.f32 %v1613_v28, %v1613_v28  ;;  %v226_v22 = vmul.f32 %v1620_v30, %v1620_v30  ;;  %v223_v28 = vmul.f32 %v1639_v36, %v1639_v36 }
  0x36   :  { %177 = vadd.xlane.f32.xlu0 %v176_v45  ;;  %v1906_v45 = vld [vmem:[%s3204_s0 + $0x1f8] sm:$0xff]  ;;  %v192_v9 = vadd.f32 %v191_v41, %v1899_v25  ;;  %v275_v25 = vsel %vm78_vm0, %v210_v51, 0.0  ;;  %v283_v51 = vsel %vm78_vm0, %v214_v53, 0.0  ;;  %v230_v30 = vmul.f32 %v1646_v38, %v1646_v38 }
  0x37   :  { %3242 = vst [vmem:[#allocation12_spill] sm:$0xff] %v1906_v45  ;;  %v203_v57 = vsel %vm78_vm0, %v1906_v45, 0.0  ;;  %v209_v45 = vmul.f32 %v1555_v10, %v1555_v10  ;;  %v213_v10 = vmul.f32 %v1540_v5, %v1540_v5  ;;  %v217_v5 = vmul.f32 %v1580_v18, %v1580_v18 }
  0x38   :  { %v204_v41 = vadd.f32 %v203_v57, %v1918_v13  ;;  %v221_v18 = vmul.f32 %v1606_v26, %v1606_v26  ;;  %v225_v26 = vmul.f32 %v1632_v34, %v1632_v34  ;;  %v229_v34 = vmul.f32 %v1658_v42, %v1658_v42 }
  0x39   :  { %189 = vadd.xlane.f32.xlu1 %v188_v21  ;;  %v1927_v21 = vld [vmem:[%s3204_s0 + $0x1e0] sm:$0xff]  ;;  %v276_v57 = vadd.f32 %v275_v25, %v209_v45  ;;  %v284_v25 = vadd.f32 %v283_v51, %v213_v10  ;;  %v227_v36 = vmul.f32 %v1665_v44, %v1665_v44  ;;  %v234_v38 = vmul.f32 %v1672_v46, %v1672_v46 }
  0x3a   :  { %185 = vadd.xlane.f32.xlu0 %v184_v29  ;;  %v208_v29 = vmul.f32 %v1535_v4, %v1535_v4  ;;  %v200_v11 = vadd.f32 %v199_v35, %v1927_v21  ;;  %v212_v4 = vmul.f32 %v1523_v1, %v1523_v1  ;;  %v216_v1 = vmul.f32 %v1573_v15, %v1573_v15 }
  0x3b   :  { %v220_v15 = vmul.f32 %v1599_v23, %v1599_v23  ;;  %v224_v23 = vmul.f32 %v1625_v31, %v1625_v31  ;;  %v228_v31 = vmul.f32 %v1651_v39, %v1651_v39  ;;  %v232_v39 = vmul.f32 %v1677_v47, %v1677_v47 }
  0x3c   :  { %v271_v19 = vsel %vm78_vm0, %v208_v29, 0.0  ;;  %v287_v45 = vsel %vm78_vm0, %v216_v1, 0.0  ;;  %v299_v29 = vsel %vm78_vm0, %v222_v14, 0.0  ;;  %v233_v42 = vmul.f32 %v1684_v50, %v1684_v50 }
  0x3d   :  { %197 = vadd.xlane.f32.xlu1 %v196_v61  ;;  %v279_v61 = vsel %vm78_vm0, %v212_v4, 0.0  ;;  %v288_v35 = vadd.f32 %v287_v45, %v215_v0  ;;  %v303_v10 = vsel %vm78_vm0, %v224_v23, 0.0  ;;  %v231_v44 = vmul.f32 %v1691_v52, %v1691_v52 }
  0x3e   :  { %193 = vadd.xlane.f32.xlu0 %v192_v9  ;;  %v272_v9 = vadd.f32 %v271_v19, %v207_v37  ;;  %v280_v19 = vadd.f32 %v279_v61, %v211_v2  ;;  %v291_v37 = vsel %vm78_vm0, %v218_v6, 0.0  ;;  %v304_v51 = vadd.f32 %v303_v10, %v223_v28 }
  0x3f   :  { %v292_v53 = vadd.f32 %v291_v37, %v217_v5  ;;  %v315_v2 = vsel %vm78_vm0, %v230_v30, 0.0  ;;  %v311_v6 = vsel %vm78_vm0, %v228_v31, 0.0  ;;  %v238_v46 = vmul.f32 %v1698_v54, %v1698_v54 }
  0x40   :  { %v316_v61 = vadd.f32 %v315_v2, %v229_v34  ;;  %v312_v1 = vadd.f32 %v311_v6, %v227_v36  ;;  %v319_v5 = vsel %vm78_vm0, %v232_v39, 0.0  ;;  %v236_v47 = vmul.f32 %v1703_v55, %v1703_v55  ;;  %v3245_v2 = vld [vmem:[#allocation3_spill] sm:$0xff]  ;;  %v3246_v36 = vld [vmem:[#allocation4_spill] sm:$0xff]  ;;  %v3247_v6 = vld [vmem:[#allocation5_spill] sm:$0xff] }
  0x41   :  { %205 = vadd.xlane.f32.xlu1 %v204_v41  ;;  %v295_v41 = vsel %vm78_vm0, %v220_v15, 0.0  ;;  %v237_v50 = vmul.f32 %v1710_v58, %v1710_v58  ;;  %v320_v37 = vadd.f32 %v319_v5, %v231_v44  ;;  %v331_v0 = vsel %vm78_vm0, %v238_v46, 0.0  ;;  %v3249_v44 = vld [vmem:[#allocation7_spill] sm:$0xff]  ;;  %v3250_v5 = vld [vmem:[#allocation8_spill] sm:$0xff] }
  0x42   :  { %201 = vadd.xlane.f32.xlu0 %v200_v11  ;;  %v300_v11 = vadd.f32 %v299_v29, %v221_v18  ;;  %v296_v4 = vadd.f32 %v295_v41, %v219_v20  ;;  %v235_v52 = vmul.f32 %v1717_v60, %v1717_v60  ;;  %v242_v54 = vmul.f32 %v1724_v62, %v1724_v62 }
  0x43   :  { %v327_v14 = vsel %vm78_vm0, %v236_v47, 0.0  ;;  %v240_v55 = vmul.f32 %v1729_v63, %v1729_v63  ;;  %v332_v45 = vadd.f32 %v331_v0, %v237_v50  ;;  %v241_v58 = vmul.f32 %v1736_v8, %v1736_v8  ;;  %v3251_v50 = vld [vmem:[#allocation9_spill] sm:$0xff] }
  0x44   :  { %v328_v15 = vadd.f32 %v327_v14, %v235_v52  ;;  %v239_v60 = vmul.f32 %v1743_v12, %v1743_v12  ;;  %v246_v62 = vmul.f32 %v1750_v16, %v1750_v16  ;;  %v244_v63 = vmul.f32 %v1755_v17, %v1755_v17  ;;  %v3252_v52 = vld [vmem:[#allocation10_spill] sm:$0xff] }
  0x45   :  { %277 = vadd.xlane.f32.xlu1 %v276_v57  ;;  %v307_v57 = vsel %vm78_vm0, %v226_v22, 0.0  ;;  %v335_v18 = vsel %vm78_vm0, %v240_v55, 0.0  ;;  %v245_v8 = vmul.f32 %v1762_v24, %v1762_v24  ;;  %v243_v12 = vmul.f32 %v1769_v27, %v1769_v27 }
  0x46   :  { %273 = vadd.xlane.f32.xlu0 %v272_v9  ;;  %v308_v9 = vadd.f32 %v307_v57, %v225_v26  ;;  %v336_v29 = vadd.f32 %v335_v18, %v239_v60  ;;  %v347_v20 = vsel %vm78_vm0, %v246_v62, 0.0  ;;  %v250_v16 = vmul.f32 %v1776_v32, %v1776_v32  ;;  %v3255_v62 = vld [vmem:[#allocation13_spill] sm:$0xff] }
  0x47   :  { %v343_v22 = vsel %vm78_vm0, %v244_v63, 0.0  ;;  %v248_v17 = vmul.f32 %v1781_v33, %v1781_v33  ;;  %v348_v41 = vadd.f32 %v347_v20, %v245_v8  ;;  %v249_v24 = vmul.f32 %v1788_v40, %v1788_v40 }
  0x48   :  { %v344_v23 = vadd.f32 %v343_v22, %v243_v12  ;;  %v247_v27 = vmul.f32 %v1795_v43, %v1795_v43  ;;  %v254_v32 = vmul.f32 %v1802_v48, %v1802_v48  ;;  %v252_v33 = vmul.f32 %v1807_v49, %v1807_v49 }
  0x49   :  { %285 = vadd.xlane.f32.xlu1 %v284_v25  ;;  %v323_v25 = vsel %vm78_vm0, %v234_v38, 0.0  ;;  %v351_v26 = vsel %vm78_vm0, %v248_v17, 0.0  ;;  %v253_v57 = vmul.f32 %v1814_v56, %v1814_v56  ;;  %v251_v48 = vmul.f32 %v1821_v59, %v1821_v59 }
  0x4a   :  { %281 = vadd.xlane.f32.xlu0 %v280_v19  ;;  %v324_v19 = vadd.f32 %v323_v25, %v233_v42  ;;  %v352_v28 = vadd.f32 %v351_v26, %v247_v27  ;;  %v363_v43 = vsel %vm78_vm0, %v254_v32, 0.0  ;;  %v258_v30 = vmul.f32 %v1828_v3, %v1828_v3 }
  0x4b   :  { %v359_v49 = vsel %vm78_vm0, %v252_v33, 0.0  ;;  %v256_v10 = vmul.f32 %v1833_v7, %v1833_v7  ;;  %v364_v31 = vadd.f32 %v363_v43, %v253_v57  ;;  %v255_v59 = vmul.f32 %v3245_v2, %v3245_v2 }
  0x4c   :  { %v360_v34 = vadd.f32 %v359_v49, %v251_v48  ;;  %v262_v3 = vmul.f32 %v3246_v36, %v3246_v36  ;;  %v260_v7 = vmul.f32 %v3247_v6, %v3247_v6  ;;  %v259_v46 = vmul.f32 %v3249_v44, %v3249_v44 }
  0x4d   :  { %293 = vadd.xlane.f32.xlu1 %v292_v53  ;;  %v339_v53 = vsel %vm78_vm0, %v242_v54, 0.0  ;;  %v367_v38 = vsel %vm78_vm0, %v256_v10, 0.0  ;;  %v266_v47 = vmul.f32 %v3250_v5, %v3250_v5  ;;  %v265_v54 = vmul.f32 %v3252_v52, %v3252_v52 }
  0x4e   :  { %289 = vadd.xlane.f32.xlu0 %v288_v35  ;;  %v340_v35 = vadd.f32 %v339_v53, %v241_v58  ;;  %v379_v25 = vsel %vm78_vm0, %v262_v3, 0.0  ;;  %v268_v18 = vmul.f32 %v3255_v62, %v3255_v62  ;;  %v267_v20 = vmul.f32 %v1927_v21, %v1927_v21 }
  0x4f   :  { %v387_v55 = vsel %vm78_vm0, %v266_v47, 0.0 }
  0x50   :  { %v388_v63 = vadd.f32 %v387_v55, %v265_v54  ;;  %v391_v12 = vsel %vm78_vm0, %v268_v18, 0.0 }
  0x51   :  { %301 = vadd.xlane.f32.xlu1 %v300_v11  ;;  %v355_v11 = vsel %vm78_vm0, %v250_v16, 0.0  ;;  %v392_v22 = vadd.f32 %v391_v12, %v267_v20 }
  0x52   :  { %297 = vadd.xlane.f32.xlu0 %v296_v4  ;;  %v1494_v4 = vmov 0   ;;  %v356_v40 = vadd.f32 %v355_v11, %v249_v24 }
  0x53   :  { %1365 = vset.pattern.permute.xlu1 %v1494_v4  ;;  %1364 = vset.pattern.permute.xlu0 %v1494_v4 }
  0x55   :  { %309 = vadd.xlane.f32.xlu1 %v308_v9  ;;  %v3244_v9 = vld [vmem:[#allocation2_spill] sm:$0xff] }
  0x56   :  { %305 = vadd.xlane.f32.xlu0 %v304_v51  ;;  %v257_v56 = vmul.f32 %v3244_v9, %v3244_v9  ;;  %v371_v51 = vsel %vm78_vm0, %v258_v30, 0.0 }
  0x58   :  { %v372_v39 = vadd.f32 %v371_v51, %v257_v56 }
  0x59   :  { %317 = vadd.xlane.f32.xlu1 %v316_v61  ;;  %v3248_v61 = vld [vmem:[#allocation6_spill] sm:$0xff] }
  0x5a   :  { %313 = vadd.xlane.f32.xlu0 %v312_v1  ;;  %v261_v42 = vmul.f32 %v3248_v61, %v3248_v61  ;;  %v368_v1 = vadd.f32 %v367_v38, %v255_v59 }
  0x5c   :  { %v380_v0 = vadd.f32 %v379_v25, %v261_v42 }
  0x5d   :  { %325 = vadd.xlane.f32.xlu1 %v324_v19  ;;  %v375_v19 = vsel %vm78_vm0, %v260_v7, 0.0 }
  0x5e   :  { %321 = vadd.xlane.f32.xlu0 %v320_v37  ;;  %v264_v37 = vmul.f32 %v3251_v50, %v3251_v50  ;;  %v376_v14 = vadd.f32 %v375_v19, %v259_v46 }
  0x60   :  { %v383_v60 = vsel %vm78_vm0, %v264_v37, 0.0 }
  0x61   :  { %333 = vadd.xlane.f32.xlu1 %v332_v45  ;;  %v3253_v45 = vld [vmem:[#allocation11_spill] sm:$0xff] }
  0x62   :  { %329 = vadd.xlane.f32.xlu0 %v328_v15  ;;  %v263_v58 = vmul.f32 %v3253_v45, %v3253_v45  ;;  %v3254_v15 = vld [vmem:[#allocation12_spill] sm:$0xff] }
  0x63   :  { %v270_v53 = vmul.f32 %v3254_v15, %v3254_v15 }
  0x64   :  { %v384_v8 = vadd.f32 %v383_v60, %v263_v58 }
  0x65   :  { %341 = vadd.xlane.f32.xlu1 %v340_v35  ;;  %v269_v35 = vmul.f32 %v1918_v13, %v1918_v13 }
  0x66   :  { %337 = vadd.xlane.f32.xlu0 %v336_v29  ;;  %v395_v29 = vsel %vm78_vm0, %v270_v53, 0.0 }
  0x67   :  { %v396_v16 = vadd.f32 %v395_v29, %v269_v35 }
  0x69   :  { %349 = vadd.xlane.f32.xlu1 %v348_v41 }
  0x6a   :  { %345 = vadd.xlane.f32.xlu0 %v344_v23 }
  0x6d   :  { %357 = vadd.xlane.f32.xlu1 %v356_v40 }
  0x6e   :  { %353 = vadd.xlane.f32.xlu0 %v352_v28 }
  0x71   :  { %365 = vadd.xlane.f32.xlu1 %v364_v31 }
  0x72   :  { %361 = vadd.xlane.f32.xlu0 %v360_v34 }
  0x75   :  { %373 = vadd.xlane.f32.xlu1 %v372_v39 }
  0x76   :  { %369 = vadd.xlane.f32.xlu0 %v368_v1 }
  0x79   :  { %381 = vadd.xlane.f32.xlu1 %v380_v0 }
  0x7a   :  { %377 = vadd.xlane.f32.xlu0 %v376_v14 }
  0x7d   :  { %389 = vadd.xlane.f32.xlu1 %v388_v63 }
  0x7e   :  { %385 = vadd.xlane.f32.xlu0 %v384_v8 }
  0x81   :  { %397 = vadd.xlane.f32.xlu1 %v396_v16 }
  0x82   :  { %393 = vadd.xlane.f32.xlu0 %v392_v22 }
  0x92   :  { %v90_v17 = vpop.xlane.xlu1 %89 }
  0x93   :  { %v82_v41 = vpop.xlane.xlu0 %81  ;;  %v2149_v5 = vmul.f32 0.0051020407, %v90_v17 }
  0x94   :  { %v2143_v61 = vmul.f32 0.0051020407, %v82_v41 }
  0x95   :  { %v465_v15 = vmul.f32 %v2149_v5, %v2149_v5 }
  0x96   :  { %v94_v24 = vpop.xlane.xlu1 %93  ;;  %v463_v47 = vmul.f32 %v2143_v61, %v2143_v61 }
  0x97   :  { %v86_v23 = vpop.xlane.xlu0 %85  ;;  %v2145_v1 = vmul.f32 0.0051020407, %v94_v24 }
  0x98   :  { %v2139_v7 = vmul.f32 0.0051020407, %v86_v23 }
  0x99   :  { %v466_v54 = vmul.f32 %v2145_v1, %v2145_v1 }
  0x9a   :  { %v102_v13 = vpop.xlane.xlu1 %101  ;;  %v464_v25 = vmul.f32 %v2139_v7, %v2139_v7 }
  0x9b   :  { %v98_v11 = vpop.xlane.xlu0 %97  ;;  %v2153_v37 = vmul.f32 0.0051020407, %v102_v13 }
  0x9c   :  { %v2157_v14 = vmul.f32 0.0051020407, %v98_v11 }
  0x9d   :  { %v468_v63 = vmul.f32 %v2153_v37, %v2153_v37 }
  0x9e   :  { %v2091_v27 = vpop.xlane.xlu1 %109  ;;  %v467_v20 = vmul.f32 %v2157_v14, %v2157_v14 }
  0x9f   :  { %v106_v32 = vpop.xlane.xlu0 %105 }
  0xa0   :  { %v2165_v17 = vmul.f32 0.0051020407, %v106_v32 }
  0xa2   :  { %v2093_v26 = vpop.xlane.xlu1 %117 }
  0xa3   :  { %v2095_v21 = vpop.xlane.xlu0 %113 }
  0xa6   :  { %v2097_v33 = vpop.xlane.xlu1 %125 }
  0xa7   :  { %v2099_v4 = vpop.xlane.xlu0 %121 }
  0xaa   :  { %v2101_v40 = vpop.xlane.xlu1 %133 }
  0xab   :  { %v2103_v57 = vpop.xlane.xlu0 %129 }
  0xae   :  { %v2105_v28 = vpop.xlane.xlu1 %141 }
  0xaf   :  { %v2107_v43 = vpop.xlane.xlu0 %137 }
  0xb2   :  { %v2109_v48 = vpop.xlane.xlu1 %149 }
  0xb3   :  { %v2111_v30 = vpop.xlane.xlu0 %145 }
  0xb6   :  { %v2113_v49 = vpop.xlane.xlu1 %157 }
  0xb7   :  { %v2115_v10 = vpop.xlane.xlu0 %153 }
  0xba   :  { %v2117_v31 = vpop.xlane.xlu1 %165 }
  0xbb   :  { %v2119_v9 = vpop.xlane.xlu0 %161 }
  0xbe   :  { %v2121_v56 = vpop.xlane.xlu1 %173 }
  0xbf   :  { %v2123_v34 = vpop.xlane.xlu0 %169 }
  0xc2   :  { %v2125_v51 = vpop.xlane.xlu1 %181 }
  0xc3   :  { %v2127_v2 = vpop.xlane.xlu0 %177 }
  0xc6   :  { %v2129_v59 = vpop.xlane.xlu1 %189 }
  0xc7   :  { %v2131_v36 = vpop.xlane.xlu0 %185 }
  0xca   :  { %v2133_v3 = vpop.xlane.xlu1 %197 }
  0xcb   :  { %v2135_v38 = vpop.xlane.xlu0 %193 }
  0xce   :  { %v2137_v6 = vpop.xlane.xlu1 %205 }
  0xcf   :  { %v2141_v39 = vpop.xlane.xlu0 %201 }
  0xd2   :  { %v278_v42 = vpop.xlane.xlu1 %277 }
  0xd3   :  { %v432_v44 = vmul.f32 0.0051020407, %v278_v42  ;;  %v274_v46 = vpop.xlane.xlu0 %273 }
  0xd4   :  { %v431_v19 = vmul.f32 0.0051020407, %v274_v46  ;;  %v2171_v46 = vmul.f32 0.0051020407, %v2093_v26 }
  0xd5   :  { %v496_v50 = vsub.f32 %v432_v44, %v464_v25  ;;  %v2168_v44 = vmul.f32 0.0051020407, %v2091_v27 }
  0xd6   :  { %v495_v0 = vsub.f32 %v431_v19, %v463_v47  ;;  %v286_v52 = vpop.xlane.xlu1 %285  ;;  %v469_v19 = vmul.f32 %v2165_v17, %v2165_v17  ;;  %v472_v26 = vmul.f32 %v2171_v46, %v2171_v46 }
  0xd7   :  { %v528_v55 = vmax.f32 %v496_v50, 0.0  ;;  %v434_v45 = vmul.f32 0.0051020407, %v286_v52  ;;  %v282_v58 = vpop.xlane.xlu0 %281  ;;  %v470_v27 = vmul.f32 %v2168_v44, %v2168_v44 }
  0xd8   :  { %v527_v53 = vmax.f32 %v495_v0, 0.0  ;;  %v433_v60 = vmul.f32 0.0051020407, %v282_v58  ;;  %v2180_v58 = vmul.f32 0.0051020407, %v2097_v33 }
  0xd9   :  { %v560_v62 = vadd.f32 1e-05, %v528_v55  ;;  %v498_v18 = vsub.f32 %v434_v45, %v466_v54  ;;  %v2195_v33 = vmul.f32 0.0051020407, %v2101_v40 }
  0xda   :  { %v559_v35 = vadd.f32 1e-05, %v527_v53  ;;  %v497_v8 = vsub.f32 %v433_v60, %v465_v15  ;;  %v294_v29 = vpop.xlane.xlu1 %293  ;;  %v624_v60 = vld [vmem:[%s3205_s1 + $0x8] sm:$0xff] }
  0xdb   :  { %1366 = vrsqrt.f32 %v560_v62  ;;  %v530_v12 = vmax.f32 %v498_v18, 0.0  ;;  %v436_v16 = vmul.f32 0.0051020407, %v294_v29  ;;  %v290_v22 = vpop.xlane.xlu0 %289  ;;  %v2186_v62 = vmul.f32 0.0051020407, %v2095_v21 }
  0xdc   :  { %1368 = vrsqrt.f32 %v559_v35  ;;  %v529_v41 = vmax.f32 %v497_v8, 0.0  ;;  %v435_v24 = vmul.f32 0.0051020407, %v290_v22  ;;  %v2189_v18 = vmul.f32 0.0051020407, %v2099_v4 }
  0xdd   :  { %v500_v23 = vsub.f32 %v436_v16, %v468_v63  ;;  %v562_v13 = vadd.f32 1e-05, %v530_v12  ;;  %v623_v63 = vld [vmem:[%s3205_s1] sm:$0xff]  ;;  %v474_v4 = vmul.f32 %v2180_v58, %v2180_v58  ;;  %v471_v40 = vmul.f32 %v2186_v62, %v2186_v62 }
  0xde   :  { %v561_v11 = vadd.f32 1e-05, %v529_v41  ;;  %v499_v42 = vsub.f32 %v435_v24, %v467_v20  ;;  %v302_v25 = vpop.xlane.xlu1 %301 }
  0xdf   :  { %v298_v47 = vpop.xlane.xlu0 %297  ;;  %v532_v0 = vmax.f32 %v500_v23, 0.0  ;;  %v438_v52 = vmul.f32 0.0051020407, %v302_v25  ;;  %v2208_v25 = vmul.f32 0.0051020407, %v2103_v57 }
  0xe0   :  { %1370 = vrsqrt.f32 %v561_v11  ;;  %v531_v32 = vmax.f32 %v499_v42, 0.0  ;;  %v437_v50 = vmul.f32 0.0051020407, %v298_v47  ;;  %v473_v42 = vmul.f32 %v2189_v18, %v2189_v18 }
  0xe1   :  { %1372 = vrsqrt.f32 %v562_v13  ;;  %v564_v8 = vadd.f32 1e-05, %v532_v0  ;;  %v502_v29 = vsub.f32 %v438_v52, %v470_v27  ;;  %v2211_v47 = vmul.f32 0.0051020407, %v2105_v28 }
  0xe2   :  { %v563_v54 = vadd.f32 1e-05, %v531_v32  ;;  %v501_v55 = vsub.f32 %v437_v50, %v469_v19  ;;  %v310_v45 = vpop.xlane.xlu1 %309  ;;  %v625_v19 = vld [vmem:[%s3205_s1 + $0x10] sm:$0xff]  ;;  %v476_v32 = vmul.f32 %v2195_v33, %v2195_v33 }
  0xe3   :  { %v440_v15 = vmul.f32 0.0051020407, %v310_v45  ;;  %v306_v53 = vpop.xlane.xlu0 %305  ;;  %v534_v57 = vmax.f32 %v502_v29, 0.0  ;;  %v626_v29 = vld [vmem:[%s3205_s1 + $0x18] sm:$0xff] }
  0xe4   :  { %1374 = vrsqrt.f32 %v563_v54  ;;  %v533_v16 = vmax.f32 %v501_v55, 0.0  ;;  %v439_v22 = vmul.f32 0.0051020407, %v306_v53 }
  0xe5   :  { %v1367_v35 = vpop.eup %1366  ;;  %v504_v20 = vsub.f32 %v440_v15, %v472_v26  ;;  %1376 = vrsqrt.f32 %v564_v8  ;;  %v2230_v8 = vmul.f32 0.0051020407, %v2109_v48 }
  0xe6   :  { %v1369_v12 = vpop.eup %1368  ;;  %v318_v21 = vpop.xlane.xlu1 %317  ;;  %v2197_v41 = vmul.f32 %v1367_v35, %v624_v60  ;;  %v565_v55 = vadd.f32 1e-05, %v533_v16  ;;  %v503_v28 = vsub.f32 %v439_v22, %v471_v40  ;;  %v478_v35 = vmul.f32 %v2211_v47, %v2211_v47 }
  0xe7   :  { %v536_v24 = vmax.f32 %v504_v20, 0.0  ;;  %v442_v23 = vmul.f32 0.0051020407, %v318_v21  ;;  %v314_v13 = vpop.xlane.xlu0 %313  ;;  %v2201_v11 = vmul.f32 %v1369_v12, %v623_v63  ;;  %v475_v63 = vmul.f32 %v2208_v25, %v2208_v25 }
  0xe8   :  { %790 = vperm.xlu1 %1365, %v2197_v41   ;;  %v441_v52 = vmul.f32 0.0051020407, %v314_v13  ;;  %v2227_v20 = vmul.f32 0.0051020407, %v2107_v43  ;;  %v535_v43 = vmax.f32 %v503_v28, 0.0 }
  0xe9   :  { %v568_v50 = vadd.f32 1e-05, %v536_v24  ;;  %v506_v0 = vsub.f32 %v442_v23, %v474_v4  ;;  %785 = vperm.xlu0 %1364, %v2201_v11   ;;  %v2237_v4 = vmul.f32 0.0051020407, %v2111_v30  ;;  %v566_v24 = vadd.f32 1e-05, %v534_v57 }
  0xea   :  { %v1371_v54 = vpop.eup %1370  ;;  %v326_v45 = vpop.xlane.xlu1 %325  ;;  %3256 = vst [vmem:[#allocation2_spill] sm:$0xff] %v2227_v20  ;;  %v505_v16 = vsub.f32 %v441_v52, %v473_v42  ;;  %v477_v42 = vmul.f32 %v2227_v20, %v2227_v20  ;;  %v2246_v30 = vmul.f32 0.0051020407, %v2113_v49  ;;  %v627_v52 = vld [vmem:[%s3205_s1 + $0x20] sm:$0xff]  ;;  %v567_v49 = vadd.f32 1e-05, %v535_v43 }
  0xeb   :  { %1378 = vrsqrt.f32 %v568_v50  ;;  %v538_v27 = vmax.f32 %v506_v0, 0.0  ;;  %v444_v26 = vmul.f32 0.0051020407, %v326_v45  ;;  %v322_v15 = vpop.xlane.xlu0 %321  ;;  %v2220_v53 = vmul.f32 %v1371_v54, %v625_v19  ;;  %v1373_v60 = vpop.eup %1372  ;;  %3257 = vst [vmem:[#allocation3_spill] sm:$0xff] %v2237_v4 }
  0xec   :  { %v443_v21 = vmul.f32 0.0051020407, %v322_v15  ;;  %1380 = vrsqrt.f32 %v565_v55  ;;  %v2239_v19 = vmul.f32 %v1373_v60, %v626_v29  ;;  %v2249_v0 = vmul.f32 0.0051020407, %v2115_v10 }
  0xed   :  { %v570_v12 = vadd.f32 1e-05, %v538_v27  ;;  %v508_v22 = vsub.f32 %v444_v26, %v476_v32  ;;  %795 = vperm.xlu1 %1365, %v2220_v53   ;;  %v480_v32 = vmul.f32 %v2230_v8, %v2230_v8  ;;  %v537_v54 = vmax.f32 %v505_v16, 0.0 }
  0xee   :  { %v334_v23 = vpop.xlane.xlu1 %333  ;;  %v1375_v50 = vpop.eup %1374  ;;  %3258 = vst [vmem:[#allocation4_spill] sm:$0xff] %v2249_v0  ;;  %v507_v55 = vsub.f32 %v443_v21, %v475_v63  ;;  %v2257_v45 = vmul.f32 %v2237_v4, %v2237_v4  ;;  %v632_v63 = vld [vmem:[%s3205_s1 + $0x48] sm:$0xff]  ;;  %v2268_v16 = vmul.f32 %v2249_v0, %v2249_v0  ;;  %v2274_v21 = vmul.f32 0.0051020407, %v2119_v9 }
  0xef   :  { %1382 = vrsqrt.f32 %v570_v12  ;;  %v540_v48 = vmax.f32 %v508_v22, 0.0  ;;  %v446_v13 = vmul.f32 0.0051020407, %v334_v23  ;;  %v330_v40 = vpop.xlane.xlu0 %329  ;;  %v2259_v29 = vmul.f32 %v1375_v50, %v627_v52 }
  0xf0   :  { %1384 = vrsqrt.f32 %v566_v24  ;;  %v445_v27 = vmul.f32 0.0051020407, %v330_v40  ;;  %v482_v12 = vmul.f32 %v2246_v30, %v2246_v30  ;;  %v2271_v22 = vmul.f32 0.0051020407, %v2117_v31  ;;  %3260 = vst [vmem:[#allocation6_spill] sm:$0xff] %v2274_v21  ;;  %v628_v24 = vld [vmem:[%s3205_s1 + $0x28] sm:$0xff] }
  0xf1   :  { %v572_v57 = vadd.f32 1e-05, %v540_v48  ;;  %v510_v28 = vsub.f32 %v446_v13, %v478_v35  ;;  %800 = vperm.xlu1 %1365, %v2239_v19   ;;  %v1377_v35 = vpop.eup %1376  ;;  %v569_v23 = vadd.f32 1e-05, %v537_v54  ;;  %v539_v48 = vmax.f32 %v507_v55, 0.0  ;;  %v634_v54 = vld [vmem:[%s3205_s1 + $0x58] sm:$0xff] }
  0xf2   :  { %v342_v26 = vpop.xlane.xlu1 %341  ;;  %3259 = vst [vmem:[#allocation5_spill] sm:$0xff] %v2271_v22  ;;  %v509_v50 = vsub.f32 %v445_v27, %v477_v42  ;;  %v2282_v0 = vmul.f32 %v1377_v35, %v628_v24  ;;  %v2291_v42 = vmul.f32 %v2274_v21, %v2274_v21  ;;  %v2297_v27 = vmul.f32 0.0051020407, %v2123_v34 }
  0xf3   :  { %1386 = vrsqrt.f32 %v572_v57  ;;  %v542_v10 = vmax.f32 %v510_v28, 0.0  ;;  %v448_v15 = vmul.f32 0.0051020407, %v342_v26  ;;  %v338_v60 = vpop.xlane.xlu0 %337 }
  0xf4   :  { %1388 = vrsqrt.f32 %v567_v49  ;;  %v447_v52 = vmul.f32 0.0051020407, %v338_v60  ;;  %v2294_v49 = vmul.f32 0.0051020407, %v2121_v56  ;;  %3262 = vst [vmem:[#allocation8_spill] sm:$0xff] %v2297_v27  ;;  %v541_v24 = vmax.f32 %v509_v50, 0.0 }
  0xf5   :  { %v1379_v43 = vpop.eup %1378  ;;  %v574_v13 = vadd.f32 1e-05, %v542_v10  ;;  %v512_v40 = vsub.f32 %v448_v15, %v480_v32  ;;  %805 = vperm.xlu1 %1365, %v2259_v29   ;;  %v484_v32 = vmul.f32 %v2271_v22, %v2271_v22  ;;  %v629_v10 = vld [vmem:[%s3205_s1 + $0x30] sm:$0xff]  ;;  %v571_v60 = vadd.f32 1e-05, %v539_v48 }
  0xf6   :  { %v350_v57 = vpop.xlane.xlu1 %349  ;;  %v2280_v31 = vmul.f32 %v1379_v43, %v632_v63  ;;  %v1381_v55 = vpop.eup %1380  ;;  %3261 = vst [vmem:[#allocation7_spill] sm:$0xff] %v2294_v49  ;;  %v511_v56 = vsub.f32 %v447_v52, %v2257_v45  ;;  %v486_v48 = vmul.f32 %v2294_v49, %v2294_v49  ;;  %v2316_v45 = vmul.f32 %v2297_v27, %v2297_v27 }
  0xf7   :  { %1390 = vrsqrt.f32 %v574_v13  ;;  %v544_v9 = vmax.f32 %v512_v40, 0.0  ;;  %v450_v28 = vmul.f32 0.0051020407, %v350_v57  ;;  %v346_v26 = vpop.xlane.xlu0 %345  ;;  %v2307_v4 = vmul.f32 %v1381_v55, %v629_v10 }
  0xf8   :  { %830 = vperm.xlu0 %1364, %v2280_v31   ;;  %1392 = vrsqrt.f32 %v569_v23  ;;  %v449_v43 = vmul.f32 0.0051020407, %v346_v26  ;;  %v636_v23 = vld [vmem:[%s3205_s1 + $0x68] sm:$0xff]  ;;  %v2319_v50 = vmul.f32 0.0051020407, %v2125_v51 }
  0xf9   :  { %v1383_v15 = vpop.eup %1382  ;;  %v576_v63 = vadd.f32 1e-05, %v544_v9  ;;  %v514_v35 = vsub.f32 %v450_v28, %v482_v12  ;;  %810 = vperm.xlu1 %1365, %v2282_v0   ;;  %v2322_v52 = vmul.f32 0.0051020407, %v2127_v2  ;;  %v630_v9 = vld [vmem:[%s3205_s1 + $0x38] sm:$0xff] }
  0xfa   :  { %v358_v13 = vpop.xlane.xlu1 %357  ;;  %v2305_v34 = vmul.f32 %v1383_v15, %v634_v54  ;;  %v1385_v12 = vpop.eup %1384  ;;  %3263 = vst [vmem:[#allocation9_spill] sm:$0xff] %v2319_v50  ;;  %v573_v10 = vadd.f32 1e-05, %v541_v24  ;;  %v543_v15 = vmax.f32 %v511_v56, 0.0  ;;  %v513_v51 = vsub.f32 %v449_v43, %v2268_v16  ;;  %v631_v43 = vld [vmem:[%s3205_s1 + $0x40] sm:$0xff] }
  0xfb   :  { %1394 = vrsqrt.f32 %v576_v63  ;;  %v546_v40 = vmax.f32 %v514_v35, 0.0  ;;  %v452_v57 = vmul.f32 0.0051020407, %v358_v13  ;;  %v354_v21 = vpop.xlane.xlu0 %353  ;;  %3264 = vst [vmem:[#allocation10_spill] sm:$0xff] %v2322_v52  ;;  %v2332_v49 = vmul.f32 %v1385_v12, %v630_v9 }
  0xfc   :  { %840 = vperm.xlu0 %1364, %v2305_v34   ;;  %1396 = vrsqrt.f32 %v571_v60  ;;  %v451_v55 = vmul.f32 0.0051020407, %v354_v21  ;;  %v488_v60 = vmul.f32 %v2319_v50, %v2319_v50  ;;  %v2341_v16 = vmul.f32 %v2322_v52, %v2322_v52 }
  0xfd   :  { %v1387_v28 = vpop.eup %1386  ;;  %v578_v26 = vadd.f32 1e-05, %v546_v40  ;;  %v516_v54 = vsub.f32 %v452_v57, %v484_v32  ;;  %815 = vperm.xlu1 %1365, %v2307_v4   ;;  %v638_v32 = vld [vmem:[%s3205_s1 + $0x78] sm:$0xff]  ;;  %v2344_v24 = vmul.f32 0.0051020407, %v2129_v59 }
  0xfe   :  { %v366_v63 = vpop.xlane.xlu1 %365  ;;  %v2330_v2 = vmul.f32 %v1387_v28, %v636_v23  ;;  %v1389_v21 = vpop.eup %1388  ;;  %v2347_v56 = vmul.f32 0.0051020407, %v2131_v36  ;;  %v515_v23 = vsub.f32 %v451_v55, %v2291_v42  ;;  %v575_v59 = vadd.f32 1e-05, %v543_v15  ;;  %v640_v42 = vld [vmem:[%s3205_s1 + $0x88] sm:$0xff]  ;;  %v633_v15 = vld [vmem:[%s3205_s1 + $0x50] sm:$0xff] }
  0xff   :  { %1398 = vrsqrt.f32 %v578_v26  ;;  %v548_v35 = vmax.f32 %v516_v54, 0.0  ;;  %v454_v13 = vmul.f32 0.0051020407, %v366_v63  ;;  %v362_v27 = vpop.xlane.xlu0 %361  ;;  %3265 = vst [vmem:[#allocation11_spill] sm:$0xff] %v2344_v24  ;;  %v545_v28 = vmax.f32 %v513_v51, 0.0 }
 0x100   :  { %850 = vperm.xlu0 %1364, %v2330_v2   ;;  %v453_v9 = vmul.f32 0.0051020407, %v362_v27  ;;  %1400 = vrsqrt.f32 %v573_v10  ;;  %v2357_v20 = vmul.f32 %v1389_v21, %v631_v43  ;;  %v490_v27 = vmul.f32 %v2344_v24, %v2344_v24 }
 0x101   :  { %v1391_v40 = vpop.eup %1390  ;;  %v580_v57 = vadd.f32 1e-05, %v548_v35  ;;  %v518_v12 = vsub.f32 %v454_v13, %v486_v48  ;;  %820 = vperm.xlu1 %1365, %v2332_v49   ;;  %v489_v48 = vmul.f32 %v2347_v56, %v2347_v56  ;;  %v2367_v55 = vmul.f32 0.0051020407, %v2133_v3 }
 0x102   :  { %v374_v26 = vpop.xlane.xlu1 %373  ;;  %v2355_v36 = vmul.f32 %v1391_v40, %v638_v32  ;;  %v1393_v54 = vpop.eup %1392  ;;  %v2370_v10 = vmul.f32 0.0051020407, %v2135_v38  ;;  %v547_v35 = vmax.f32 %v515_v23, 0.0  ;;  %v517_v32 = vsub.f32 %v453_v9, %v2316_v45  ;;  %v642_v45 = vld [vmem:[%s3205_s1 + $0x98] sm:$0xff]  ;;  %v635_v9 = vld [vmem:[%s3205_s1 + $0x60] sm:$0xff] }
 0x103   :  { %1402 = vrsqrt.f32 %v580_v57  ;;  %v550_v63 = vmax.f32 %v518_v12, 0.0  ;;  %v456_v52 = vmul.f32 0.0051020407, %v374_v26  ;;  %v370_v50 = vpop.xlane.xlu0 %369  ;;  %3266 = vst [vmem:[#allocation12_spill] sm:$0xff] %v2367_v55  ;;  %v577_v3 = vadd.f32 1e-05, %v545_v28 }
 0x104   :  { %860 = vperm.xlu0 %1364, %v2355_v36   ;;  %1404 = vrsqrt.f32 %v575_v59  ;;  %v455_v43 = vmul.f32 0.0051020407, %v370_v50  ;;  %v2380_v22 = vmul.f32 %v1393_v54, %v633_v15  ;;  %v491_v50 = vmul.f32 %v2370_v10, %v2370_v10 }
 0x105   :  { %v1395_v51 = vpop.eup %1394  ;;  %v582_v13 = vadd.f32 1e-05, %v550_v63  ;;  %v520_v21 = vsub.f32 %v456_v52, %v488_v60  ;;  %825 = vperm.xlu1 %1365, %v2357_v20   ;;  %v492_v52 = vmul.f32 %v2367_v55, %v2367_v55  ;;  %v2390_v60 = vmul.f32 0.0051020407, %v2137_v6 }
 0x106   :  { %v382_v40 = vpop.xlane.xlu1 %381  ;;  %v2378_v38 = vmul.f32 %v1395_v51, %v640_v42  ;;  %v1397_v57 = vpop.eup %1396  ;;  %v579_v28 = vadd.f32 1e-05, %v547_v35  ;;  %v549_v54 = vmax.f32 %v517_v32, 0.0  ;;  %v519_v15 = vsub.f32 %v455_v43, %v2341_v16  ;;  %v644_v35 = vld [vmem:[%s3205_s1 + $0xa8] sm:$0xff]  ;;  %v637_v43 = vld [vmem:[%s3205_s1 + $0x70] sm:$0xff] }
 0x107   :  { %1406 = vrsqrt.f32 %v582_v13  ;;  %v552_v12 = vmax.f32 %v520_v21, 0.0  ;;  %v458_v26 = vmul.f32 0.0051020407, %v382_v40  ;;  %v378_v24 = vpop.xlane.xlu0 %377  ;;  %v2400_v55 = vmul.f32 %v1397_v57, %v635_v9 }
 0x108   :  { %v457_v23 = vmul.f32 0.0051020407, %v378_v24  ;;  %870 = vperm.xlu0 %1364, %v2378_v38   ;;  %1408 = vrsqrt.f32 %v577_v3  ;;  %v494_v32 = vmul.f32 %v2390_v60, %v2390_v60  ;;  %v2408_v16 = vmul.f32 0.0051020407, %v2141_v39 }
 0x109   :  { %v1399_v59 = vpop.eup %1398  ;;  %v584_v63 = vadd.f32 1e-05, %v552_v12  ;;  %v522_v42 = vsub.f32 %v458_v26, %v490_v27  ;;  %835 = vperm.xlu1 %1365, %v2380_v22   ;;  %v581_v12 = vadd.f32 1e-05, %v549_v54 }
 0x10a   :  { %v521_v51 = vsub.f32 %v457_v23, %v489_v48  ;;  %v390_v6 = vpop.xlane.xlu1 %389  ;;  %v2398_v13 = vmul.f32 %v1399_v59, %v642_v45  ;;  %v1401_v27 = vpop.eup %1400  ;;  %v551_v23 = vmax.f32 %v519_v15, 0.0 }
 0x10b   :  { %1410 = vrsqrt.f32 %v584_v63  ;;  %v554_v24 = vmax.f32 %v522_v42, 0.0  ;;  %v460_v21 = vmul.f32 0.0051020407, %v390_v6  ;;  %v386_v40 = vpop.xlane.xlu0 %385 }
 0x10c   :  { %v553_v48 = vmax.f32 %v521_v51, 0.0  ;;  %v459_v3 = vmul.f32 0.0051020407, %v386_v40  ;;  %880 = vperm.xlu0 %1364, %v2398_v13   ;;  %1412 = vrsqrt.f32 %v579_v28  ;;  %v2417_v40 = vmul.f32 %v1401_v27, %v637_v43  ;;  %v646_v28 = vld [vmem:[%s3205_s1 + $0xb8] sm:$0xff] }
 0x10d   :  { %v1403_v57 = vpop.eup %1402  ;;  %v586_v26 = vadd.f32 1e-05, %v554_v24  ;;  %v524_v45 = vsub.f32 %v460_v21, %v492_v52  ;;  %845 = vperm.xlu1 %1365, %v2400_v55   ;;  %v493_v52 = vmul.f32 %v2408_v16, %v2408_v16  ;;  %v639_v24 = vld [vmem:[%s3205_s1 + $0x80] sm:$0xff] }
 0x10e   :  { %v585_v9 = vadd.f32 1e-05, %v553_v48  ;;  %v523_v59 = vsub.f32 %v459_v3, %v491_v50  ;;  %v398_v39 = vpop.xlane.xlu1 %397  ;;  %v2415_v63 = vmul.f32 %v1403_v57, %v644_v35  ;;  %v1405_v54 = vpop.eup %1404  ;;  %v583_v48 = vadd.f32 1e-05, %v551_v23 }
 0x10f   :  { %1414 = vrsqrt.f32 %v586_v26  ;;  %v556_v42 = vmax.f32 %v524_v45, 0.0  ;;  %v462_v51 = vmul.f32 0.0051020407, %v398_v39  ;;  %v394_v6 = vpop.xlane.xlu0 %393  ;;  %v2431_v45 = vmul.f32 %v1405_v54, %v639_v24  ;;  %v650_v54 = vld [vmem:[%s3205_s1 + $0xd8] sm:$0xff] }
 0x110   :  { %1416 = vrsqrt.f32 %v585_v9  ;;  %v555_v15 = vmax.f32 %v523_v59, 0.0  ;;  %v461_v50 = vmul.f32 0.0051020407, %v394_v6  ;;  %890 = vperm.xlu0 %1364, %v2415_v63   ;;  %v648_v9 = vld [vmem:[%s3205_s1 + $0xc8] sm:$0xff] }
 0x111   :  { %v1407_v21 = vpop.eup %1406  ;;  %1418 = vrsqrt.f32 %v581_v12  ;;  %v588_v35 = vadd.f32 1e-05, %v556_v42  ;;  %v526_v27 = vsub.f32 %v462_v51, %v494_v32  ;;  %855 = vperm.xlu1 %1365, %v2417_v40   ;;  %v641_v32 = vld [vmem:[%s3205_s1 + $0x90] sm:$0xff] }
 0x112   :  { %v587_v3 = vadd.f32 1e-05, %v555_v15  ;;  %v525_v43 = vsub.f32 %v461_v50, %v493_v52  ;;  %v2429_v57 = vmul.f32 %v1407_v21, %v646_v28  ;;  %v1409_v59 = vpop.eup %1408  ;;  %v643_v52 = vld [vmem:[%s3205_s1 + $0xa0] sm:$0xff]  ;;  %v649_v15 = vld [vmem:[%s3205_s1 + $0xd0] sm:$0xff] }
 0x113   :  { %1420 = vrsqrt.f32 %v588_v35  ;;  %v558_v26 = vmax.f32 %v526_v27, 0.0  ;;  %v2443_v28 = vmul.f32 %v1409_v59, %v641_v32 }
 0x114   :  { %1422 = vrsqrt.f32 %v587_v3  ;;  %v557_v12 = vmax.f32 %v525_v43, 0.0  ;;  %900 = vperm.xlu0 %1364, %v2429_v57   ;;  %v645_v43 = vld [vmem:[%s3205_s1 + $0xb0] sm:$0xff] }
 0x115   :  { %v1411_v23 = vpop.eup %1410  ;;  %v590_v39 = vadd.f32 1e-05, %v558_v26  ;;  %865 = vperm.xlu1 %1365, %v2431_v45   ;;  %1424 = vrsqrt.f32 %v583_v48  ;;  %v652_v48 = vld [vmem:[%s3205_s1 + $0xe8] sm:$0xff]  ;;  %v651_v26 = vld [vmem:[%s3205_s1 + $0xe0] sm:$0xff] }
 0x116   :  { %v589_v42 = vadd.f32 1e-05, %v557_v12  ;;  %v2441_v51 = vmul.f32 %v1411_v23, %v648_v9  ;;  %v1413_v6 = vpop.eup %1412  ;;  %v2473_v9 = vld [vmem:[%s3206_s2 + $0xd0] sm:$0xff] }
 0x117   :  { %1426 = vrsqrt.f32 %v590_v39  ;;  %v2458_v27 = vmul.f32 %v1413_v6, %v643_v52 }
 0x118   :  { %1428 = vrsqrt.f32 %v589_v42  ;;  %910 = vperm.xlu0 %1364, %v2441_v51   ;;  %v654_v42 = vld [vmem:[%s3205_s1 + $0xf8] sm:$0xff] }
 0x119   :  { %v1415_v50 = vpop.eup %1414  ;;  %875 = vperm.xlu1 %1365, %v2443_v28  }
 0x11a   :  { %v1417_v24 = vpop.eup %1416  ;;  %v2456_v21 = vmul.f32 %v1415_v50, %v650_v54  ;;  %v2498_v50 = vld [vmem:[%s3206_s2 + $0xe0] sm:$0xff] }
 0x11b   :  { %v1419_v35 = vpop.eup %1418  ;;  %v681_v3 = vmul.f32 %v1417_v24, %v649_v15  ;;  %v653_v15 = vld [vmem:[%s3205_s1 + $0xf0] sm:$0xff] }
 0x11c   :  { %920 = vperm.xlu0 %1364, %v2456_v21   ;;  %v2481_v39 = vmul.f32 %v1419_v35, %v645_v43 }
 0x11d   :  { %v1421_v59 = vpop.eup %1420  ;;  %885 = vperm.xlu1 %1365, %v2458_v27   ;;  %v2477_v12 = vmul.f32 %v681_v3, %v2347_v56  ;;  %v647_v56 = vld [vmem:[%s3205_s1 + $0xc0] sm:$0xff] }
 0x11e   :  { %v1423_v32 = vpop.eup %1422  ;;  %v2479_v23 = vmul.f32 %v1421_v59, %v652_v48 }
 0x11f   :  { %3267 = vst [vmem:[#allocation13_spill] sm:$0xff] %v2477_v12  ;;  %v683_v6 = vmul.f32 %v1423_v32, %v651_v26  ;;  %v1425_v52 = vpop.eup %1424  ;;  %v720_v26 = vmul.f32 %v2197_v41, %v2139_v7  ;;  %v688_v32 = vld [vmem:[%s3206_s2 + $0x8] sm:$0xff] }
 0x120   :  { %930 = vperm.xlu0 %1364, %v2479_v23   ;;  %v2508_v59 = vmul.f32 %v1425_v52, %v647_v56  ;;  %v690_v52 = vld [vmem:[%s3206_s2 + $0x18] sm:$0xff] }
 0x121   :  { %v1427_v24 = vpop.eup %1426  ;;  %895 = vperm.xlu1 %1365, %v2481_v39   ;;  %v2502_v35 = vmul.f32 %v683_v6, %v2370_v10  ;;  %v2519_v10 = vld [vmem:[%s3206_s2 + $0xf0] sm:$0xff]  ;;  %v752_v41 = vsub.f32 %v688_v32, %v720_v26  ;;  %v732_v32 = vmul.f32 %v2330_v2, %v2195_v33  ;;  %v727_v33 = vmul.f32 %v2357_v20, %v2186_v62  ;;  %v704_v62 = vld [vmem:[%s3206_s2 + $0x88] sm:$0xff] }
 0x122   :  { %v1429_v48 = vpop.eup %1428  ;;  %v2504_v43 = vmul.f32 %v1427_v24, %v654_v42  ;;  %v722_v42 = vmul.f32 %v2239_v19, %v2145_v1  ;;  %v724_v24 = vmul.f32 %v2282_v0, %v2153_v37  ;;  %v726_v19 = vmul.f32 %v2332_v49, %v2168_v44  ;;  %v687_v37 = vld [vmem:[%s3206_s2] sm:$0xff]  ;;  %v697_v20 = vld [vmem:[%s3206_s2 + $0x50] sm:$0xff] }
 0x123   :  { %v685_v54 = vmul.f32 %v1429_v48, %v653_v15  ;;  %v779_v12 = vsub.f32 %v2498_v50, %v2502_v35  ;;  %v719_v48 = vmul.f32 %v2201_v11, %v2143_v61  ;;  %v728_v0 = vmul.f32 %v2280_v31, %v2171_v46  ;;  %v696_v61 = vld [vmem:[%s3206_s2 + $0x48] sm:$0xff]  ;;  %v689_v11 = vld [vmem:[%s3206_s2 + $0x10] sm:$0xff] }
 0x124   :  { %940 = vperm.xlu0 %1364, %v2504_v43   ;;  %v754_v15 = vsub.f32 %v690_v52, %v722_v42  ;;  %v721_v44 = vmul.f32 %v2220_v53, %v2149_v5  ;;  %v723_v46 = vmul.f32 %v2259_v29, %v2157_v14  ;;  %v698_v5 = vld [vmem:[%s3206_s2 + $0x58] sm:$0xff]  ;;  %v691_v53 = vld [vmem:[%s3206_s2 + $0x20] sm:$0xff]  ;;  %v700_v14 = vld [vmem:[%s3206_s2 + $0x68] sm:$0xff]  ;;  %v734_v42 = vmul.f32 %v2355_v36, %v2211_v47 }
 0x125   :  { %905 = vperm.xlu1 %1365, %v2508_v59   ;;  %v2523_v7 = vmul.f32 %v685_v54, %v2408_v16  ;;  %v692_v16 = vld [vmem:[%s3206_s2 + $0x28] sm:$0xff]  ;;  %v751_v49 = vsub.f32 %v687_v37, %v719_v48  ;;  %v760_v26 = vsub.f32 %v696_v61, %v728_v0  ;;  %v693_v29 = vld [vmem:[%s3206_s2 + $0x30] sm:$0xff]  ;;  %v764_v52 = vsub.f32 %v700_v14, %v732_v32 }
 0x126   :  { %v756_v1 = vsub.f32 %v692_v16, %v724_v24  ;;  %v753_v31 = vsub.f32 %v689_v11, %v721_v44  ;;  %v729_v47 = vmul.f32 %v2380_v22, %v2189_v18  ;;  %v738_v16 = vmul.f32 %v2398_v13, %v2246_v30  ;;  %v706_v18 = vld [vmem:[%s3206_s2 + $0x98] sm:$0xff]  ;;  %v699_v22 = vld [vmem:[%s3206_s2 + $0x60] sm:$0xff]  ;;  %v3270_v0 = vld [vmem:[#allocation7_spill] sm:$0xff] }
 0x127   :  { %v781_v56 = vsub.f32 %v2519_v10, %v2523_v7  ;;  %v3269_v30 = vld [vmem:[#allocation2_spill] sm:$0xff]  ;;  %v3274_v32 = vld [vmem:[#allocation11_spill] sm:$0xff] }
 0x128   :  { %1014 = vperm.xlu0 %1364, %v752_v41   ;;  %v733_v13 = vmul.f32 %v2417_v40, %v3269_v30  ;;  %v710_v40 = vld [vmem:[%s3206_s2 + $0xb8] sm:$0xff]  ;;  %v703_v11 = vld [vmem:[%s3206_s2 + $0x80] sm:$0xff] }
 0x129   :  { %915 = vperm.xlu1 %1365, %v681_v3   ;;  %v694_v3 = vld [vmem:[%s3206_s2 + $0x38] sm:$0xff] }
 0x12c   :  { %1024 = vperm.xlu0 %1364, %v754_v15   ;;  %v736_v15 = vmul.f32 %v2378_v38, %v2230_v8  ;;  %v731_v8 = vmul.f32 %v2400_v55, %v2208_v25  ;;  %v761_v38 = vsub.f32 %v697_v20, %v729_v47  ;;  %v708_v25 = vld [vmem:[%s3206_s2 + $0xa8] sm:$0xff]  ;;  %v701_v55 = vld [vmem:[%s3206_s2 + $0x70] sm:$0xff] }
 0x12d   :  { %925 = vperm.xlu1 %1365, %v683_v6   ;;  %v758_v6 = vsub.f32 %v694_v3, %v726_v19  ;;  %v3268_v19 = vld [vmem:[#allocation5_spill] sm:$0xff]  ;;  %v770_v3 = vsub.f32 %v706_v18, %v738_v16  ;;  %v765_v61 = vsub.f32 %v701_v55, %v733_v13 }
 0x12e   :  { %v740_v48 = vmul.f32 %v2415_v63, %v3268_v19  ;;  %v763_v37 = vsub.f32 %v699_v22, %v731_v8  ;;  %v3271_v63 = vld [vmem:[#allocation3_spill] sm:$0xff] }
 0x130   :  { %1034 = vperm.xlu0 %1364, %v756_v1   ;;  %v768_v1 = vsub.f32 %v704_v62, %v736_v15  ;;  %v772_v44 = vsub.f32 %v708_v25, %v740_v48  ;;  %v750_v15 = vmul.f32 %v2504_v43, %v2390_v60  ;;  %v711_v62 = vld [vmem:[%s3206_s2 + $0xc0] sm:$0xff]  ;;  %v3279_v43 = vld [vmem:[#allocation13_spill] sm:$0xff] }
 0x131   :  { %935 = vperm.xlu1 %1365, %v685_v54   ;;  %v730_v54 = vmul.f32 %v2305_v34, %v2180_v58  ;;  %v725_v58 = vmul.f32 %v2307_v4, %v2165_v17  ;;  %v755_v34 = vsub.f32 %v691_v53, %v723_v46  ;;  %v702_v17 = vld [vmem:[%s3206_s2 + $0x78] sm:$0xff]  ;;  %v695_v4 = vld [vmem:[%s3206_s2 + $0x40] sm:$0xff]  ;;  %v705_v53 = vld [vmem:[%s3206_s2 + $0x90] sm:$0xff] }
 0x132   :  { %v766_v24 = vsub.f32 %v702_v17, %v734_v42  ;;  %v759_v36 = vsub.f32 %v695_v4, %v727_v33  ;;  %v3276_v42 = vld [vmem:[#allocation12_spill] sm:$0xff] }
 0x133   :  { %v762_v41 = vsub.f32 %v698_v5, %v730_v54  ;;  %v757_v2 = vsub.f32 %v693_v29, %v725_v58  ;;  %v3272_v54 = vld [vmem:[#allocation9_spill] sm:$0xff]  ;;  %v707_v29 = vld [vmem:[%s3206_s2 + $0xa0] sm:$0xff]  ;;  %v709_v4 = vld [vmem:[%s3206_s2 + $0xb0] sm:$0xff] }
 0x134   :  { %1044 = vperm.xlu0 %1364, %v758_v6   ;;  %v742_v6 = vmul.f32 %v2429_v57, %v3270_v0  ;;  %v3273_v57 = vld [vmem:[#allocation4_spill] sm:$0xff] }
 0x135   :  { %1009 = vperm.xlu1 %1365, %v751_v49   ;;  %v735_v49 = vmul.f32 %v2431_v45, %v3271_v63  ;;  %v712_v45 = vld [vmem:[%s3206_s2 + $0xc8] sm:$0xff] }
 0x136   :  { %v774_v46 = vsub.f32 %v710_v40, %v742_v6 }
 0x137   :  { %v767_v5 = vsub.f32 %v703_v11, %v735_v49 }
 0x138   :  { %1054 = vperm.xlu0 %1364, %v760_v26   ;;  %v744_v26 = vmul.f32 %v2441_v51, %v3272_v54  ;;  %v3275_v51 = vld [vmem:[#allocation6_spill] sm:$0xff]  ;;  %v1430_v54 = vld [vmem:[%s3204_s0 + $0x10] sm:$0xff] }
 0x139   :  { %1019 = vperm.xlu1 %1365, %v753_v31   ;;  %v737_v31 = vmul.f32 %v2443_v28, %v3273_v57  ;;  %v714_v28 = vld [vmem:[%s3206_s2 + $0xd8] sm:$0xff] }
 0x13a   :  { %v776_v58 = vsub.f32 %v712_v45, %v744_v26 }
 0x13b   :  { %v769_v14 = vsub.f32 %v705_v53, %v737_v31 }
 0x13c   :  { %1064 = vperm.xlu0 %1364, %v762_v41   ;;  %v746_v41 = vmul.f32 %v2456_v21, %v3274_v32  ;;  %v3277_v21 = vld [vmem:[#allocation8_spill] sm:$0xff] }
 0x13d   :  { %1029 = vperm.xlu1 %1365, %v755_v34   ;;  %v739_v34 = vmul.f32 %v2458_v27, %v3275_v51  ;;  %v716_v27 = vld [vmem:[%s3206_s2 + $0xe8] sm:$0xff]  ;;  %v1432_v32 = vld [vmem:[%s3204_s0 + $0x30] sm:$0xff] }
 0x13e   :  { %v778_v33 = vsub.f32 %v714_v28, %v746_v41 }
 0x13f   :  { %v771_v17 = vsub.f32 %v707_v29, %v739_v34 }
 0x140   :  { %1074 = vperm.xlu0 %1364, %v764_v52   ;;  %v748_v52 = vmul.f32 %v2479_v23, %v3276_v42  ;;  %v3278_v23 = vld [vmem:[#allocation10_spill] sm:$0xff] }
 0x141   :  { %1039 = vperm.xlu1 %1365, %v757_v2   ;;  %v741_v2 = vmul.f32 %v2481_v39, %v3277_v21  ;;  %v743_v47 = vmul.f32 %v2508_v59, %v3278_v23  ;;  %v718_v39 = vld [vmem:[%s3206_s2 + $0xf8] sm:$0xff] }
 0x142   :  { %v782_v20 = vsub.f32 %v718_v39, %v750_v15 }
 0x143   :  { %v775_v16 = vsub.f32 %v711_v62, %v743_v47  ;;  %v1437_v62 = vld [vmem:[%s3204_s0 + $0x78] sm:$0xff] }
 0x144   :  { %1084 = vperm.xlu0 %1364, %v766_v24   ;;  %v780_v24 = vsub.f32 %v716_v27, %v748_v52 }
 0x145   :  { %1049 = vperm.xlu1 %1365, %v759_v36   ;;  %v773_v36 = vsub.f32 %v709_v4, %v741_v2  ;;  %v1435_v2 = vld [vmem:[%s3204_s0 + $0x58] sm:$0xff] }
 0x148   :  { %1094 = vperm.xlu0 %1364, %v768_v1   ;;  %v3280_v1 = vsub.f32 %v2473_v9, %v3279_v43  ;;  %v1438_v43 = vld [vmem:[%s3204_s0] sm:$0xff] }
 0x149   :  { %1059 = vperm.xlu1 %1365, %v761_v38  }
 0x14c   :  { %1104 = vperm.xlu0 %1364, %v770_v3  }
 0x14d   :  { %1069 = vperm.xlu1 %1365, %v763_v37  }
 0x150   :  { %1114 = vperm.xlu0 %1364, %v772_v44  }
 0x151   :  { %1079 = vperm.xlu1 %1365, %v765_v61  }
 0x154   :  { %1124 = vperm.xlu0 %1364, %v774_v46   ;;  %v1431_v46 = vld [vmem:[%s3204_s0 + $0x18] sm:$0xff] }
 0x155   :  { %1089 = vperm.xlu1 %1365, %v767_v5  }
 0x158   :  { %1134 = vperm.xlu0 %1364, %v776_v58   ;;  %v1433_v58 = vld [vmem:[%s3204_s0 + $0x38] sm:$0xff] }
 0x159   :  { %1099 = vperm.xlu1 %1365, %v769_v14  }
 0x15c   :  { %1144 = vperm.xlu0 %1364, %v778_v33   ;;  %v1434_v33 = vld [vmem:[%s3204_s0 + $0x50] sm:$0xff] }
 0x15d   :  { %1109 = vperm.xlu1 %1365, %v771_v17  }
 0x160   :  { %1154 = vperm.xlu0 %1364, %v780_v24  }
 0x161   :  { %1119 = vperm.xlu1 %1365, %v773_v36   ;;  %v1436_v36 = vld [vmem:[%s3204_s0 + $0x70] sm:$0xff] }
 0x164   :  { %1164 = vperm.xlu0 %1364, %v782_v20  }
 0x165   :  { %1129 = vperm.xlu1 %1365, %v775_v16  }
 0x167   :  { %v791_v60 = vpop.permute.xlu1 %790 }
 0x168   :  { %v2678_v38 = vpop.permute.xlu0 %785  ;;  %v945_v26 = vmul.f32 %v1430_v54, %v791_v60  ;;  %v946_v57 = vmul.f32 %v1431_v46, %v791_v60 }
 0x169   :  { %1139 = vperm.xlu1 %1365, %v3280_v1   ;;  %v943_v1 = vmul.f32 %v1438_v43, %v2678_v38 }
 0x16c   :  { %v2670_v59 = vpop.permute.xlu1 %795 }
 0x16d   :  { %1149 = vperm.xlu1 %1365, %v779_v12  }
 0x170   :  { %v801_v8 = vpop.permute.xlu1 %800 }
 0x171   :  { %1159 = vperm.xlu1 %1365, %v781_v56   ;;  %v949_v41 = vmul.f32 %v1432_v32, %v801_v8  ;;  %v950_v51 = vmul.f32 %v1433_v58, %v801_v8  ;;  %v1439_v8 = vld [vmem:[%s3204_s0 + $0x8] sm:$0xff] }
 0x174   :  { %v2680_v18 = vpop.permute.xlu1 %805 }
 0x177   :  { %v2682_v22 = vpop.permute.xlu0 %830 }
 0x178   :  { %v811_v19 = vpop.permute.xlu1 %810 }
 0x179   :  { %v953_v21 = vmul.f32 %v1434_v33, %v811_v19  ;;  %v954_v17 = vmul.f32 %v1435_v2, %v811_v19  ;;  %v944_v19 = vmul.f32 %v1439_v8, %v2678_v38 }
 0x17b   :  { %v2684_v9 = vpop.permute.xlu0 %840 }
 0x17c   :  { %v2686_v48 = vpop.permute.xlu1 %815 }
 0x17f   :  { %v2688_v3 = vpop.permute.xlu0 %850 }
 0x180   :  { %v821_v50 = vpop.permute.xlu1 %820 }
 0x181   :  { %v957_v39 = vmul.f32 %v1436_v36, %v821_v50  ;;  %v958_v20 = vmul.f32 %v1437_v62, %v821_v50 }
 0x183   :  { %v2690_v12 = vpop.permute.xlu0 %860 }
 0x184   :  { %v2692_v35 = vpop.permute.xlu1 %825 }
 0x187   :  { %v2694_v10 = vpop.permute.xlu0 %870 }
 0x188   :  { %v2696_v7 = vpop.permute.xlu1 %835 }
 0x18b   :  { %v2698_v56 = vpop.permute.xlu0 %880 }
 0x18c   :  { %v2700_v30 = vpop.permute.xlu1 %845 }
 0x18f   :  { %v2702_v13 = vpop.permute.xlu0 %890 }
 0x190   :  { %v2704_v37 = vpop.permute.xlu1 %855 }
 0x193   :  { %v2706_v25 = vpop.permute.xlu0 %900 }
 0x194   :  { %v2708_v55 = vpop.permute.xlu1 %865 }
 0x197   :  { %v2710_v0 = vpop.permute.xlu0 %910 }
 0x198   :  { %v2712_v6 = vpop.permute.xlu1 %875 }
 0x19b   :  { %v2714_v44 = vpop.permute.xlu0 %920 }
 0x19c   :  { %v2716_v63 = vpop.permute.xlu1 %885 }
 0x19f   :  { %v2718_v49 = vpop.permute.xlu0 %930 }
 0x1a0   :  { %v2720_v61 = vpop.permute.xlu1 %895 }
 0x1a3   :  { %v2722_v40 = vpop.permute.xlu0 %940 }
 0x1a4   :  { %v2724_v11 = vpop.permute.xlu1 %905 }
 0x1a7   :  { %v1015_v31 = vpop.permute.xlu0 %1014 }
 0x1a8   :  { %v2732_v5 = vpop.permute.xlu1 %915  ;;  %v1169_v45 = vadd.f32 %v1015_v31, %v945_v26  ;;  %v1170_v53 = vadd.f32 %v1015_v31, %v946_v57 }
 0x1aa   :  { %v1233_v34 = vmax.f32 %v1169_v45, 0.0  ;;  %v1234_v14 = vmax.f32 %v1170_v53, 0.0  ;;  %v1440_v45 = vld [vmem:[%s3204_s0 + $0x90] sm:$0xff]  ;;  %v1441_v53 = vld [vmem:[%s3204_s0 + $0x98] sm:$0xff] }
 0x1ab   :  { %v1025_v28 = vpop.permute.xlu0 %1024  ;;  %v961_v38 = vmul.f32 %v1440_v45, %v2682_v22  ;;  %v962_v32 = vmul.f32 %v1441_v53, %v2682_v22 }
 0x1ac   :  { %1297 = vst [vmem:[%s3207_s3 + $0x10] sm:$0xff] %v1233_v34  ;;  %1298 = vst.msk [vmem:[%s3207_s3 + $0x18] sm:$0xff] %vm78_vm0, %v1234_v14  ;;  %v2747_v29 = vpop.permute.xlu1 %925  ;;  %v1173_v42 = vadd.f32 %v1025_v28, %v949_v41  ;;  %v1174_v52 = vadd.f32 %v1025_v28, %v950_v51  ;;  %v1442_v51 = vld [vmem:[%s3204_s0 + $0x20] sm:$0xff]  ;;  %v1443_v14 = vld [vmem:[%s3204_s0 + $0x28] sm:$0xff] }
 0x1ad   :  { %v947_v34 = vmul.f32 %v1442_v51, %v2670_v59  ;;  %v948_v28 = vmul.f32 %v1443_v14, %v2670_v59 }
 0x1ae   :  { %v1237_v27 = vmax.f32 %v1173_v42, 0.0  ;;  %v1238_v4 = vmax.f32 %v1174_v52, 0.0 }
 0x1af   :  { %v1035_v15 = vpop.permute.xlu0 %1034 }
 0x1b0   :  { %1301 = vst [vmem:[%s3207_s3 + $0x30] sm:$0xff] %v1237_v27  ;;  %1302 = vst.msk [vmem:[%s3207_s3 + $0x38] sm:$0xff] %vm78_vm0, %v1238_v4  ;;  %v2762_v24 = vpop.permute.xlu1 %935  ;;  %v1177_v23 = vadd.f32 %v1035_v15, %v953_v21  ;;  %v1178_v47 = vadd.f32 %v1035_v15, %v954_v17  ;;  %v1444_v27 = vld [vmem:[%s3204_s0 + $0xb0] sm:$0xff]  ;;  %v1445_v15 = vld [vmem:[%s3204_s0 + $0xb8] sm:$0xff] }
 0x1b1   :  { %v965_v4 = vmul.f32 %v1444_v27, %v2684_v9 }
 0x1b2   :  { %v1241_v16 = vmax.f32 %v1177_v23, 0.0  ;;  %v1242_v60 = vmax.f32 %v1178_v47, 0.0  ;;  %v966_v23 = vmul.f32 %v1445_v15, %v2684_v9 }
 0x1b3   :  { %v1045_v54 = vpop.permute.xlu0 %1044 }
 0x1b4   :  { %1305 = vst [vmem:[%s3207_s3 + $0x50] sm:$0xff] %v1241_v16  ;;  %1306 = vst.msk [vmem:[%s3207_s3 + $0x58] sm:$0xff] %vm78_vm0, %v1242_v60  ;;  %v1010_v50 = vpop.permute.xlu1 %1009  ;;  %v1181_v26 = vadd.f32 %v1045_v54, %v957_v39  ;;  %v1182_v46 = vadd.f32 %v1045_v54, %v958_v20  ;;  %v1446_v39 = vld [vmem:[%s3204_s0 + $0x40] sm:$0xff]  ;;  %v1447_v20 = vld [vmem:[%s3204_s0 + $0x48] sm:$0xff] }
 0x1b5   :  { %v1167_v57 = vadd.f32 %v1010_v50, %v943_v1  ;;  %v1168_v31 = vadd.f32 %v1010_v50, %v944_v19  ;;  %v951_v62 = vmul.f32 %v1446_v39, %v2680_v18  ;;  %v952_v16 = vmul.f32 %v1447_v20, %v2680_v18  ;;  %v1448_v50 = vld [vmem:[%s3204_s0 + $0xd0] sm:$0xff] }
 0x1b6   :  { %v1245_v41 = vmax.f32 %v1181_v26, 0.0  ;;  %v1246_v58 = vmax.f32 %v1182_v46, 0.0  ;;  %v969_v26 = vmul.f32 %v1448_v50, %v2688_v3  ;;  %v1449_v46 = vld [vmem:[%s3204_s0 + $0xd8] sm:$0xff] }
 0x1b7   :  { %v1231_v42 = vmax.f32 %v1167_v57, 0.0  ;;  %v1232_v52 = vmax.f32 %v1168_v31, 0.0  ;;  %v1055_v33 = vpop.permute.xlu0 %1054  ;;  %v970_v57 = vmul.f32 %v1449_v46, %v2688_v3 }
 0x1b8   :  { %1309 = vst [vmem:[%s3207_s3 + $0x70] sm:$0xff] %v1245_v41  ;;  %1310 = vst.msk [vmem:[%s3207_s3 + $0x78] sm:$0xff] %vm78_vm0, %v1246_v58  ;;  %v1020_v22 = vpop.permute.xlu1 %1019  ;;  %v1185_v21 = vadd.f32 %v1055_v33, %v961_v38  ;;  %v1186_v2 = vadd.f32 %v1055_v33, %v962_v32  ;;  %v1450_v38 = vld [vmem:[%s3204_s0 + $0x60] sm:$0xff]  ;;  %v1451_v32 = vld [vmem:[%s3204_s0 + $0x68] sm:$0xff] }
 0x1b9   :  { %1295 = vst [vmem:[%s3207_s3] sm:$0xff] %v1231_v42  ;;  %1296 = vst.msk [vmem:[%s3207_s3 + $0x8] sm:$0xff] %vm78_vm0, %v1232_v52  ;;  %v1171_v59 = vadd.f32 %v1020_v22, %v947_v34  ;;  %v1172_v17 = vadd.f32 %v1020_v22, %v948_v28  ;;  %v955_v53 = vmul.f32 %v1450_v38, %v2686_v48  ;;  %v1452_v52 = vld [vmem:[%s3204_s0 + $0xf0] sm:$0xff]  ;;  %v1453_v22 = vld [vmem:[%s3204_s0 + $0xf8] sm:$0xff] }
 0x1ba   :  { %v1249_v47 = vmax.f32 %v1185_v21, 0.0  ;;  %v1250_v36 = vmax.f32 %v1186_v2, 0.0  ;;  %v956_v41 = vmul.f32 %v1451_v32, %v2686_v48  ;;  %v973_v33 = vmul.f32 %v1452_v52, %v2690_v12 }
 0x1bb   :  { %v1235_v60 = vmax.f32 %v1171_v59, 0.0  ;;  %v1236_v43 = vmax.f32 %v1172_v17, 0.0  ;;  %v1065_v1 = vpop.permute.xlu0 %1064  ;;  %v974_v21 = vmul.f32 %v1453_v22, %v2690_v12  ;;  %v1454_v17 = vld [vmem:[%s3204_s0 + $0x80] sm:$0xff] }
 0x1bc   :  { %1313 = vst [vmem:[%s3207_s3 + $0x90] sm:$0xff] %v1249_v47  ;;  %1314 = vst.msk [vmem:[%s3207_s3 + $0x98] sm:$0xff] %vm78_vm0, %v1250_v36  ;;  %v1030_v9 = vpop.permute.xlu1 %1029  ;;  %v1189_v8 = vadd.f32 %v1065_v1, %v965_v4  ;;  %v1190_v19 = vadd.f32 %v1065_v1, %v966_v23  ;;  %v959_v27 = vmul.f32 %v1454_v17, %v2692_v35  ;;  %v1455_v4 = vld [vmem:[%s3204_s0 + $0x88] sm:$0xff] }
 0x1bd   :  { %1299 = vst [vmem:[%s3207_s3 + $0x20] sm:$0xff] %v1235_v60  ;;  %1300 = vst.msk [vmem:[%s3207_s3 + $0x28] sm:$0xff] %vm78_vm0, %v1236_v43  ;;  %v1175_v18 = vadd.f32 %v1030_v9, %v951_v62  ;;  %v1176_v54 = vadd.f32 %v1030_v9, %v952_v16  ;;  %v960_v15 = vmul.f32 %v1455_v4, %v2692_v35  ;;  %v1456_v16 = vld [vmem:[%s3204_s0 + $0x110] sm:$0xff]  ;;  %v1457_v43 = vld [vmem:[%s3204_s0 + $0x118] sm:$0xff] }
 0x1be   :  { %v1253_v31 = vmax.f32 %v1189_v8, 0.0  ;;  %v1254_v45 = vmax.f32 %v1190_v19, 0.0  ;;  %v977_v60 = vmul.f32 %v1456_v16, %v2694_v10  ;;  %v978_v1 = vmul.f32 %v1457_v43, %v2694_v10  ;;  %v1458_v19 = vld [vmem:[%s3204_s0 + $0xa0] sm:$0xff] }
 0x1bf   :  { %v1239_v58 = vmax.f32 %v1175_v18, 0.0  ;;  %v1240_v51 = vmax.f32 %v1176_v54, 0.0  ;;  %v1075_v34 = vpop.permute.xlu0 %1074  ;;  %v963_v18 = vmul.f32 %v1458_v19, %v2696_v7  ;;  %v1459_v54 = vld [vmem:[%s3204_s0 + $0xa8] sm:$0xff] }
 0x1c0   :  { %1317 = vst [vmem:[%s3207_s3 + $0xb0] sm:$0xff] %v1253_v31  ;;  %1318 = vst.msk [vmem:[%s3207_s3 + $0xb8] sm:$0xff] %vm78_vm0, %v1254_v45  ;;  %v1040_v3 = vpop.permute.xlu1 %1039  ;;  %v1193_v14 = vadd.f32 %v1075_v34, %v969_v26  ;;  %v1194_v28 = vadd.f32 %v1075_v34, %v970_v57  ;;  %v964_v50 = vmul.f32 %v1459_v54, %v2696_v7 }
 0x1c1   :  { %1303 = vst [vmem:[%s3207_s3 + $0x40] sm:$0xff] %v1239_v58  ;;  %1304 = vst.msk [vmem:[%s3207_s3 + $0x48] sm:$0xff] %vm78_vm0, %v1240_v51  ;;  %v1179_v48 = vadd.f32 %v1040_v3, %v955_v53  ;;  %v1180_v42 = vadd.f32 %v1040_v3, %v956_v41  ;;  %v1460_v53 = vld [vmem:[%s3204_s0 + $0x130] sm:$0xff]  ;;  %v1461_v41 = vld [vmem:[%s3204_s0 + $0x138] sm:$0xff] }
 0x1c2   :  { %v1257_v2 = vmax.f32 %v1193_v14, 0.0  ;;  %v1258_v59 = vmax.f32 %v1194_v28, 0.0  ;;  %v981_v32 = vmul.f32 %v1460_v53, %v2698_v56  ;;  %v982_v58 = vmul.f32 %v1461_v41, %v2698_v56  ;;  %v1462_v3 = vld [vmem:[%s3204_s0 + $0xc0] sm:$0xff]  ;;  %v1463_v28 = vld [vmem:[%s3204_s0 + $0xc8] sm:$0xff] }
 0x1c3   :  { %v1243_v23 = vmax.f32 %v1179_v48, 0.0  ;;  %v1244_v47 = vmax.f32 %v1180_v42, 0.0  ;;  %v1085_v36 = vpop.permute.xlu0 %1084  ;;  %v967_v14 = vmul.f32 %v1462_v3, %v2700_v30  ;;  %v968_v48 = vmul.f32 %v1463_v28, %v2700_v30 }
 0x1c4   :  { %1321 = vst [vmem:[%s3207_s3 + $0xd0] sm:$0xff] %v1257_v2  ;;  %1322 = vst.msk [vmem:[%s3207_s3 + $0xd8] sm:$0xff] %vm78_vm0, %v1258_v59  ;;  %v1050_v12 = vpop.permute.xlu1 %1049  ;;  %v1197_v39 = vadd.f32 %v1085_v36, %v973_v33  ;;  %v1198_v62 = vadd.f32 %v1085_v36, %v974_v21  ;;  %v1464_v59 = vld [vmem:[%s3204_s0 + $0x150] sm:$0xff] }
 0x1c5   :  { %1307 = vst [vmem:[%s3207_s3 + $0x60] sm:$0xff] %v1243_v23  ;;  %1308 = vst.msk [vmem:[%s3207_s3 + $0x68] sm:$0xff] %vm78_vm0, %v1244_v47  ;;  %v1183_v35 = vadd.f32 %v1050_v12, %v959_v27  ;;  %v1184_v20 = vadd.f32 %v1050_v12, %v960_v15  ;;  %v985_v17 = vmul.f32 %v1464_v59, %v2702_v13  ;;  %v1465_v27 = vld [vmem:[%s3204_s0 + $0x158] sm:$0xff]  ;;  %v1466_v47 = vld [vmem:[%s3204_s0 + $0xe0] sm:$0xff] }
 0x1c6   :  { %v1261_v9 = vmax.f32 %v1197_v39, 0.0  ;;  %v1262_v8 = vmax.f32 %v1198_v62, 0.0  ;;  %v986_v4 = vmul.f32 %v1465_v27, %v2702_v13  ;;  %v971_v36 = vmul.f32 %v1466_v47, %v2704_v37  ;;  %v1467_v12 = vld [vmem:[%s3204_s0 + $0xe8] sm:$0xff] }
 0x1c7   :  { %v1247_v26 = vmax.f32 %v1183_v35, 0.0  ;;  %v1248_v46 = vmax.f32 %v1184_v20, 0.0  ;;  %v1095_v57 = vpop.permute.xlu0 %1094  ;;  %v972_v39 = vmul.f32 %v1467_v12, %v2704_v37 }
 0x1c8   :  { %1325 = vst [vmem:[%s3207_s3 + $0xf0] sm:$0xff] %v1261_v9  ;;  %1326 = vst.msk [vmem:[%s3207_s3 + $0xf8] sm:$0xff] %vm78_vm0, %v1262_v8  ;;  %v1060_v10 = vpop.permute.xlu1 %1059  ;;  %v1201_v31 = vadd.f32 %v1095_v57, %v977_v60  ;;  %v1202_v45 = vadd.f32 %v1095_v57, %v978_v1  ;;  %v1468_v1 = vld [vmem:[%s3204_s0 + $0x170] sm:$0xff]  ;;  %v1469_v8 = vld [vmem:[%s3204_s0 + $0x178] sm:$0xff] }
 0x1c9   :  { %1311 = vst [vmem:[%s3207_s3 + $0x80] sm:$0xff] %v1247_v26  ;;  %1312 = vst.msk [vmem:[%s3207_s3 + $0x88] sm:$0xff] %vm78_vm0, %v1248_v46  ;;  %v1187_v7 = vadd.f32 %v1060_v10, %v963_v18  ;;  %v1188_v38 = vadd.f32 %v1060_v10, %v964_v50  ;;  %v989_v9 = vmul.f32 %v1468_v1, %v2706_v25  ;;  %v1470_v50 = vld [vmem:[%s3204_s0 + $0x100] sm:$0xff]  ;;  %v1471_v46 = vld [vmem:[%s3204_s0 + $0x108] sm:$0xff] }
 0x1ca   :  { %v1265_v51 = vmax.f32 %v1201_v31, 0.0  ;;  %v1266_v34 = vmax.f32 %v1202_v45, 0.0  ;;  %v990_v19 = vmul.f32 %v1469_v8, %v2706_v25  ;;  %v975_v26 = vmul.f32 %v1470_v50, %v2708_v55 }
 0x1cb   :  { %v1251_v42 = vmax.f32 %v1187_v7, 0.0  ;;  %v1252_v52 = vmax.f32 %v1188_v38, 0.0  ;;  %v1105_v33 = vpop.permute.xlu0 %1104  ;;  %v976_v57 = vmul.f32 %v1471_v46, %v2708_v55 }
 0x1cc   :  { %1329 = vst [vmem:[%s3207_s3 + $0x110] sm:$0xff] %v1265_v51  ;;  %1330 = vst.msk [vmem:[%s3207_s3 + $0x118] sm:$0xff] %vm78_vm0, %v1266_v34  ;;  %v1070_v56 = vpop.permute.xlu1 %1069  ;;  %v1205_v22 = vadd.f32 %v1105_v33, %v981_v32  ;;  %v1206_v21 = vadd.f32 %v1105_v33, %v982_v58  ;;  %v1472_v32 = vld [vmem:[%s3204_s0 + $0x190] sm:$0xff]  ;;  %v1473_v58 = vld [vmem:[%s3204_s0 + $0x198] sm:$0xff] }
 0x1cd   :  { %1315 = vst [vmem:[%s3207_s3 + $0xa0] sm:$0xff] %v1251_v42  ;;  %1316 = vst.msk [vmem:[%s3207_s3 + $0xa8] sm:$0xff] %vm78_vm0, %v1252_v52  ;;  %v1191_v30 = vadd.f32 %v1070_v56, %v967_v14  ;;  %v1192_v2 = vadd.f32 %v1070_v56, %v968_v48  ;;  %v993_v41 = vmul.f32 %v1472_v32, %v2710_v0  ;;  %v1474_v14 = vld [vmem:[%s3204_s0 + $0x120] sm:$0xff]  ;;  %v1475_v48 = vld [vmem:[%s3204_s0 + $0x128] sm:$0xff] }
 0x1ce   :  { %v1269_v15 = vmax.f32 %v1205_v22, 0.0  ;;  %v1270_v23 = vmax.f32 %v1206_v21, 0.0  ;;  %v994_v51 = vmul.f32 %v1473_v58, %v2710_v0  ;;  %v979_v28 = vmul.f32 %v1474_v14, %v2712_v6 }
 0x1cf   :  { %v1255_v62 = vmax.f32 %v1191_v30, 0.0  ;;  %v1256_v35 = vmax.f32 %v1192_v2, 0.0  ;;  %v1115_v20 = vpop.permute.xlu0 %1114  ;;  %v980_v42 = vmul.f32 %v1475_v48, %v2712_v6  ;;  %v1476_v2 = vld [vmem:[%s3204_s0 + $0x1b0] sm:$0xff] }
 0x1d0   :  { %1333 = vst [vmem:[%s3207_s3 + $0x130] sm:$0xff] %v1269_v15  ;;  %1334 = vst.msk [vmem:[%s3207_s3 + $0x138] sm:$0xff] %vm78_vm0, %v1270_v23  ;;  %v1080_v13 = vpop.permute.xlu1 %1079  ;;  %v1209_v16 = vadd.f32 %v1115_v20, %v985_v17  ;;  %v1210_v60 = vadd.f32 %v1115_v20, %v986_v4  ;;  %v997_v59 = vmul.f32 %v1476_v2, %v2714_v44  ;;  %v1477_v17 = vld [vmem:[%s3204_s0 + $0x1b8] sm:$0xff]  ;;  %v1478_v23 = vld [vmem:[%s3204_s0 + $0x140] sm:$0xff] }
 0x1d1   :  { %1319 = vst [vmem:[%s3207_s3 + $0xc0] sm:$0xff] %v1255_v62  ;;  %1320 = vst.msk [vmem:[%s3207_s3 + $0xc8] sm:$0xff] %vm78_vm0, %v1256_v35  ;;  %v1195_v37 = vadd.f32 %v1080_v13, %v971_v36  ;;  %v1196_v43 = vadd.f32 %v1080_v13, %v972_v39  ;;  %v998_v27 = vmul.f32 %v1477_v17, %v2714_v44  ;;  %v1479_v36 = vld [vmem:[%s3204_s0 + $0x148] sm:$0xff] }
 0x1d2   :  { %v1273_v18 = vmax.f32 %v1209_v16, 0.0  ;;  %v1274_v54 = vmax.f32 %v1210_v60, 0.0  ;;  %v983_v47 = vmul.f32 %v1478_v23, %v2716_v63  ;;  %v984_v12 = vmul.f32 %v1479_v36, %v2716_v63  ;;  %v1480_v60 = vld [vmem:[%s3204_s0 + $0x1d0] sm:$0xff] }
 0x1d3   :  { %v1259_v10 = vmax.f32 %v1195_v37, 0.0  ;;  %v1260_v31 = vmax.f32 %v1196_v43, 0.0  ;;  %v1125_v45 = vpop.permute.xlu0 %1124  ;;  %v1001_v37 = vmul.f32 %v1480_v60, %v2718_v49  ;;  %v1481_v43 = vld [vmem:[%s3204_s0 + $0x1d8] sm:$0xff] }
 0x1d4   :  { %1337 = vst [vmem:[%s3207_s3 + $0x150] sm:$0xff] %v1273_v18  ;;  %1338 = vst.msk [vmem:[%s3207_s3 + $0x158] sm:$0xff] %vm78_vm0, %v1274_v54  ;;  %v1090_v25 = vpop.permute.xlu1 %1089  ;;  %v1213_v7 = vadd.f32 %v1125_v45, %v989_v9  ;;  %v1214_v38 = vadd.f32 %v1125_v45, %v990_v19  ;;  %v1002_v1 = vmul.f32 %v1481_v43, %v2718_v49  ;;  %v1482_v19 = vld [vmem:[%s3204_s0 + $0x160] sm:$0xff]  ;;  %v1483_v54 = vld [vmem:[%s3204_s0 + $0x168] sm:$0xff] }
 0x1d5   :  { %1323 = vst [vmem:[%s3207_s3 + $0xe0] sm:$0xff] %v1259_v10  ;;  %1324 = vst.msk [vmem:[%s3207_s3 + $0xe8] sm:$0xff] %vm78_vm0, %v1260_v31  ;;  %v1199_v55 = vadd.f32 %v1090_v25, %v975_v26  ;;  %v1200_v53 = vadd.f32 %v1090_v25, %v976_v57  ;;  %v987_v18 = vmul.f32 %v1482_v19, %v2720_v61  ;;  %v1484_v25 = vld [vmem:[%s3204_s0 + $0x1f0] sm:$0xff] }
 0x1d6   :  { %v1277_v34 = vmax.f32 %v1213_v7, 0.0  ;;  %v1278_v3 = vmax.f32 %v1214_v38, 0.0  ;;  %v988_v50 = vmul.f32 %v1483_v54, %v2720_v61  ;;  %v1005_v7 = vmul.f32 %v1484_v25, %v2722_v40  ;;  %v1485_v38 = vld [vmem:[%s3204_s0 + $0x1f8] sm:$0xff] }
 0x1d7   :  { %v1263_v52 = vmax.f32 %v1199_v55, 0.0  ;;  %v1264_v33 = vmax.f32 %v1200_v53, 0.0  ;;  %v1135_v56 = vpop.permute.xlu0 %1134  ;;  %v1006_v55 = vmul.f32 %v1485_v38, %v2722_v40 }
 0x1d8   :  { %1341 = vst [vmem:[%s3207_s3 + $0x170] sm:$0xff] %v1277_v34  ;;  %1342 = vst.msk [vmem:[%s3207_s3 + $0x178] sm:$0xff] %vm78_vm0, %v1278_v3  ;;  %v1100_v0 = vpop.permute.xlu1 %1099  ;;  %v1217_v22 = vadd.f32 %v1135_v56, %v993_v41  ;;  %v1218_v21 = vadd.f32 %v1135_v56, %v994_v51  ;;  %v1486_v41 = vld [vmem:[%s3204_s0 + $0x180] sm:$0xff]  ;;  %v1487_v51 = vld [vmem:[%s3204_s0 + $0x188] sm:$0xff] }
 0x1d9   :  { %1327 = vst [vmem:[%s3207_s3 + $0x100] sm:$0xff] %v1263_v52  ;;  %1328 = vst.msk [vmem:[%s3207_s3 + $0x108] sm:$0xff] %vm78_vm0, %v1264_v33  ;;  %v1203_v6 = vadd.f32 %v1100_v0, %v979_v28  ;;  %v1204_v30 = vadd.f32 %v1100_v0, %v980_v42  ;;  %v991_v58 = vmul.f32 %v1486_v41, %v2724_v11  ;;  %v1488_v0 = vld [vmem:[%s3204_s0 + $0x1a0] sm:$0xff] }
 0x1da   :  { %v1281_v4 = vmax.f32 %v1217_v22, 0.0  ;;  %v1282_v15 = vmax.f32 %v1218_v21, 0.0  ;;  %v992_v34 = vmul.f32 %v1487_v51, %v2724_v11  ;;  %v995_v22 = vmul.f32 %v1488_v0, %v2732_v5  ;;  %v1489_v21 = vld [vmem:[%s3204_s0 + $0x1a8] sm:$0xff] }
 0x1db   :  { %v1267_v39 = vmax.f32 %v1203_v6, 0.0  ;;  %v1268_v62 = vmax.f32 %v1204_v30, 0.0  ;;  %v1145_v35 = vpop.permute.xlu0 %1144  ;;  %v996_v6 = vmul.f32 %v1489_v21, %v2732_v5 }
 0x1dc   :  { %1345 = vst [vmem:[%s3207_s3 + $0x190] sm:$0xff] %v1281_v4  ;;  %1346 = vst.msk [vmem:[%s3207_s3 + $0x198] sm:$0xff] %vm78_vm0, %v1282_v15  ;;  %v1110_v44 = vpop.permute.xlu1 %1109  ;;  %v1221_v20 = vadd.f32 %v1145_v35, %v997_v59  ;;  %v1222_v13 = vadd.f32 %v1145_v35, %v998_v27  ;;  %v1490_v27 = vld [vmem:[%s3204_s0 + $0x1c0] sm:$0xff]  ;;  %v1491_v15 = vld [vmem:[%s3204_s0 + $0x1c8] sm:$0xff] }
 0x1dd   :  { %1331 = vst [vmem:[%s3207_s3 + $0x120] sm:$0xff] %v1267_v39  ;;  %1332 = vst.msk [vmem:[%s3207_s3 + $0x128] sm:$0xff] %vm78_vm0, %v1268_v62  ;;  %v1207_v63 = vadd.f32 %v1110_v44, %v983_v47  ;;  %v1208_v16 = vadd.f32 %v1110_v44, %v984_v12  ;;  %v999_v4 = vmul.f32 %v1490_v27, %v2747_v29  ;;  %v1492_v35 = vld [vmem:[%s3204_s0 + $0x1e0] sm:$0xff]  ;;  %v1493_v44 = vld [vmem:[%s3204_s0 + $0x1e8] sm:$0xff] }
 0x1de   :  { %v1285_v9 = vmax.f32 %v1221_v20, 0.0  ;;  %v1286_v8 = vmax.f32 %v1222_v13, 0.0  ;;  %v1000_v23 = vmul.f32 %v1491_v15, %v2747_v29  ;;  %v1003_v29 = vmul.f32 %v1492_v35, %v2762_v24 }
 0x1df   :  { %v1271_v26 = vmax.f32 %v1207_v63, 0.0  ;;  %v1272_v46 = vmax.f32 %v1208_v16, 0.0  ;;  %v1155_v57 = vpop.permute.xlu0 %1154  ;;  %v1004_v20 = vmul.f32 %v1493_v44, %v2762_v24 }
 0x1e0   :  { %1349 = vst [vmem:[%s3207_s3 + $0x1b0] sm:$0xff] %v1285_v9  ;;  %1350 = vst.msk [vmem:[%s3207_s3 + $0x1b8] sm:$0xff] %vm78_vm0, %v1286_v8  ;;  %v1120_v49 = vpop.permute.xlu1 %1119  ;;  %v1225_v10 = vadd.f32 %v1155_v57, %v1001_v37  ;;  %v1226_v31 = vadd.f32 %v1155_v57, %v1002_v1 }
 0x1e1   :  { %1335 = vst [vmem:[%s3207_s3 + $0x140] sm:$0xff] %v1271_v26  ;;  %1336 = vst.msk [vmem:[%s3207_s3 + $0x148] sm:$0xff] %vm78_vm0, %v1272_v46  ;;  %v1211_v61 = vadd.f32 %v1120_v49, %v987_v18  ;;  %v1212_v45 = vadd.f32 %v1120_v49, %v988_v50 }
 0x1e2   :  { %v1289_v53 = vmax.f32 %v1225_v10, 0.0  ;;  %v1290_v32 = vmax.f32 %v1226_v31, 0.0 }
 0x1e3   :  { %v1275_v3 = vmax.f32 %v1211_v61, 0.0  ;;  %v1276_v14 = vmax.f32 %v1212_v45, 0.0  ;;  %v1165_v28 = vpop.permute.xlu0 %1164 }
 0x1e4   :  { %1353 = vst [vmem:[%s3207_s3 + $0x1d0] sm:$0xff] %v1289_v53  ;;  %1354 = vst.msk [vmem:[%s3207_s3 + $0x1d8] sm:$0xff] %vm78_vm0, %v1290_v32  ;;  %v1130_v40 = vpop.permute.xlu1 %1129  ;;  %v1229_v48 = vadd.f32 %v1165_v28, %v1005_v7  ;;  %v1230_v42 = vadd.f32 %v1165_v28, %v1006_v55 }
 0x1e5   :  { %1339 = vst [vmem:[%s3207_s3 + $0x160] sm:$0xff] %v1275_v3  ;;  %1340 = vst.msk [vmem:[%s3207_s3 + $0x168] sm:$0xff] %vm78_vm0, %v1276_v14  ;;  %v1215_v11 = vadd.f32 %v1130_v40, %v991_v58  ;;  %v1216_v52 = vadd.f32 %v1130_v40, %v992_v34 }
 0x1e6   :  { %v1293_v33 = vmax.f32 %v1229_v48, 0.0  ;;  %v1294_v56 = vmax.f32 %v1230_v42, 0.0 }
 0x1e7   :  { %v1279_v30 = vmax.f32 %v1215_v11, 0.0  ;;  %v1280_v2 = vmax.f32 %v1216_v52, 0.0 }
 0x1e8   :  { %1357 = vst [vmem:[%s3207_s3 + $0x1f0] sm:$0xff] %v1293_v33  ;;  %1358 = vst.msk [vmem:[%s3207_s3 + $0x1f8] sm:$0xff] %vm78_vm0, %v1294_v56  ;;  %v1140_v59 = vpop.permute.xlu1 %1139 }
 0x1e9   :  { %1343 = vst [vmem:[%s3207_s3 + $0x180] sm:$0xff] %v1279_v30  ;;  %1344 = vst.msk [vmem:[%s3207_s3 + $0x188] sm:$0xff] %vm78_vm0, %v1280_v2  ;;  %v1219_v5 = vadd.f32 %v1140_v59, %v995_v22  ;;  %v1220_v17 = vadd.f32 %v1140_v59, %v996_v6 }
 0x1eb   :  { %v1283_v47 = vmax.f32 %v1219_v5, 0.0  ;;  %v1284_v36 = vmax.f32 %v1220_v17, 0.0 }
 0x1ec   :  { %v1150_v12 = vpop.permute.xlu1 %1149 }
 0x1ed   :  { %1347 = vst [vmem:[%s3207_s3 + $0x1a0] sm:$0xff] %v1283_v47  ;;  %1348 = vst.msk [vmem:[%s3207_s3 + $0x1a8] sm:$0xff] %vm78_vm0, %v1284_v36  ;;  %v1223_v39 = vadd.f32 %v1150_v12, %v999_v4  ;;  %v1224_v62 = vadd.f32 %v1150_v12, %v1000_v23 }
 0x1ef   :  { %v1287_v13 = vmax.f32 %v1223_v39, 0.0  ;;  %v1288_v63 = vmax.f32 %v1224_v62, 0.0 }
 0x1f0   :  { %v1160_v16 = vpop.permute.xlu1 %1159 }
 0x1f1   :  { %1351 = vst [vmem:[%s3207_s3 + $0x1c0] sm:$0xff] %v1287_v13  ;;  %1352 = vst.msk [vmem:[%s3207_s3 + $0x1c8] sm:$0xff] %vm78_vm0, %v1288_v63  ;;  %v1227_v60 = vadd.f32 %v1160_v16, %v1003_v29  ;;  %v1228_v37 = vadd.f32 %v1160_v16, %v1004_v20 }
 0x1f3   :  { %v1291_v43 = vmax.f32 %v1227_v60, 0.0  ;;  %v1292_v1 = vmax.f32 %v1228_v37, 0.0 }
 0x1f5   :  { %1355 = vst [vmem:[%s3207_s3 + $0x1e0] sm:$0xff] %v1291_v43  ;;  %1356 = vst.msk [vmem:[%s3207_s3 + $0x1e8] sm:$0xff] %vm78_vm0, %v1292_v1 }

</bundles_post_ra>
